<compile_context>
chip_gen: v7x
topology: tpu7x:2x2x1
jax: 0.10.0
libtpu: 0.0.40
codegen_flags: <defaults>
</compile_context>

<pallas_src>
import math
import functools

import jax
import jax.numpy as jnp
from jax.experimental import pallas as pl
from jax.experimental.pallas import tpu as pltpu

BN_EPS = 1e-5
LEAKY_SLOPE = 0.01  # torch.nn.LeakyReLU default negative_slope


def get_higher_power_of_2(value):
    # Exact port of MLP.get_higher_power_of_2
    index = 0
    temp = value * 2
    while temp >= 2:
        temp = temp / 2
        index = index + 1
    higher_power = int(math.pow(2, index))
    if higher_power - value < value / 2:
        higher_power = higher_power * 2
    return higher_power


def _round_up(v, m):
    return ((v + m - 1) // m) * m


# ----------------------------------------------------------------------------
# Kernel: one batch tile through all layers. 3 refs in, 1 ref out.
#   x_ref   [TB, F]   bf16   input tile, zero-padded to F lanes
#   w_ref   [L, F, F] bf16   all weights (BN folded, zero-padded), one slab
#   b_ref   [L, 1, F] f32    all biases (BN folded, zero-padded), one slab
#   out_ref [TB, F]   bf16   lane-dense output tile
# ----------------------------------------------------------------------------
def _mlp_kernel(num_layers, x_ref, w_ref, b_ref, out_ref):
    h = jnp.dot(x_ref[...], w_ref[0], preferred_element_type=jnp.float32) + b_ref[0]
    for j in range(1, num_layers):
        # LeakyReLU: for 0 < slope < 1, max(h, slope*h) == leaky_relu(h).
        h = jnp.maximum(h, LEAKY_SLOPE * h)
        # Dropout: identity at inference. BatchNorm1d (eval) folded into (w, b).
        h = jnp.dot(h.astype(w_ref.dtype), w_ref[j],
                    preferred_element_type=jnp.float32) + b_ref[j]
    out_ref[...] = h.astype(out_ref.dtype)


# ----------------------------------------------------------------------------
# One-time host-side preprocessing (call once, reuse for every forward).
# ----------------------------------------------------------------------------
def prepare_params(linears, bns):
    """Fold eval-mode BN into the next Linear, zero-pad every feature dim to a
    common 128-multiple width F, pack all layers into one bf16 weight slab and
    one f32 bias slab."""
    num_layers = len(linears)
    dims = [linears[0][0].shape[0]] + [w.shape[1] for w, _ in linears]
    F = _round_up(max(dims), 128)

    ws, bs = [], []
    for j, (w, b) in enumerate(linears):
        if j > 0:
            # y = BN(x) @ W + b == x @ (diag(s) W) + (b + (beta - mean*s) @ W)
            gamma, beta, mean, var = bns[j - 1]
            s = gamma * jax.lax.rsqrt(var + BN_EPS)   # [1, fan_in]
            b = b + (beta - mean * s) @ w             # uses the ORIGINAL W
            w = w * jnp.reshape(s, (-1, 1))           # diag(s) @ W
        fan_in, fan_out = w.shape
        # Zero padding keeps padded channels exactly 0 through LeakyReLU and
        # subsequent layers (zero weight rows/cols, zero bias entries).
        w_p = jnp.zeros((F, F), jnp.float32).at[:fan_in, :fan_out].set(w)
        b_p = jnp.zeros((1, F), jnp.float32).at[:, :fan_out].set(b)
        ws.append(w_p)
        bs.append(b_p)

    # NOTE: bf16 rounding of BN-scaled weights is amplified if running_var is
    # tiny; keep the slab in f32 instead if that precision ever matters.
    params = {
        "w_slab": jnp.stack(ws).astype(jnp.bfloat16),  # [L, F, F]
        "b_slab": jnp.stack(bs),                       # [L, 1, F] f32
        "num_layers": num_layers,
        "feature_pad": F,
        "input_size": linears[0][0].shape[0],
        "expected_size": linears[-1][0].shape[1],
    }
    return params


# ----------------------------------------------------------------------------
# Per-call wrapper: pad/cast x, run the fused kernel, slice the result.
# ----------------------------------------------------------------------------
def mlp_forward(x, params, batch_tile=512):
    """batch_tile must be a multiple of 128. Pick it so the grid has an even
    number (>=2) of steps on v7x (2 TensorCores); on v5e/v6e any large tile
    is fine (single TC, fewer/larger steps just amortize overhead)."""
    B, in_dim = x.shape
    F = params["feature_pad"]
    L = params["num_layers"]
    w_slab = params["w_slab"]
    b_slab = params["b_slab"]
    expected_size = params["expected_size"]

    B_pad = _round_up(B, batch_tile)
    x_in = jnp.pad(x.astype(jnp.bfloat16), ((0, B_pad - B), (0, F - in_dim)))

    flops = 2 * B_pad * F * F * L
    bytes_accessed = (x_in.size * 2 + w_slab.size * 2 + b_slab.size * 4
                      + B_pad * F * 2)

    out = pl.pallas_call(
        functools.partial(_mlp_kernel, L),
        out_shape=jax.ShapeDtypeStruct((B_pad, F), jnp.bfloat16),
        grid=(B_pad // batch_tile,),
        in_specs=[
            pl.BlockSpec((batch_tile, F), lambda i: (i, 0)),
            pl.BlockSpec((L, F, F), lambda i: (0, 0, 0)),
            pl.BlockSpec((L, 1, F), lambda i: (0, 0, 0)),
        ],
        out_specs=pl.BlockSpec((batch_tile, F), lambda i: (i, 0)),
        compiler_params=pltpu.CompilerParams(
            dimension_semantics=("parallel",)),
        cost_estimate=pl.CostEstimate(
            flops=flops, transcendentals=0, bytes_accessed=bytes_accessed),
    )(x_in, w_slab, b_slab)

    return out[:B, :expected_size].astype(jnp.float32)


# ----------------------------------------------------------------------------
# Parameter init mirroring the torch module's shapes (eval mode BN stats).
# ----------------------------------------------------------------------------
def init_params(key, input_size, expected_size, layers):
    size = get_higher_power_of_2(input_size)
    linear_dims = [(input_size, size)]
    for _ in range(layers):
        linear_dims.append((size, size))
    linear_dims.append((size, input_size))
    linear_dims.append((input_size, expected_size))

    linears = []
    for fan_in, fan_out in linear_dims:
        key, k_w, k_b = jax.random.split(key, 3)
        bound = 1.0 / math.sqrt(fan_in)
        w = jax.random.uniform(k_w, (fan_in, fan_out), jnp.float32, -bound, bound)
        b = jax.random.uniform(k_b, (1, fan_out), jnp.float32, -bound, bound)
        linears.append((w, b))

    bn_feats = [size] * layers + [size, input_size]
    bns = [
        (
            jnp.ones((1, f), jnp.float32),   # gamma
            jnp.zeros((1, f), jnp.float32),  # beta
            jnp.zeros((1, f), jnp.float32),  # running_mean
            jnp.ones((1, f), jnp.float32),   # running_var
        )
        for f in bn_feats
    ]
    return linears, bns


def mlp_reference(x, linears, bns):
    # Pure-f32 reference matching the original module (eval mode).
    h = x @ linears[0][0] + linears[0][1]
    for j, (gamma, beta, mean, var) in enumerate(bns):
        h = jnp.where(h >= 0, h, LEAKY_SLOPE * h)
        h = (h - mean) * jax.lax.rsqrt(var + BN_EPS) * gamma + beta
        h = h @ linears[j + 1][0] + linears[j + 1][1]
    return h


if __name__ == "__main__":
    input_size = 16
    expected_size = 8
    config = {"layers": 2, "dropout": 0.2}  # dropout inactive at inference
    batch = 600  # non-divisible batch -> padding path; tile 512 -> 2 even steps

    key = jax.random.PRNGKey(0)
    key_x, key_p = jax.random.split(key)
    x = jax.random.normal(key_x, (batch, input_size), jnp.float32)

    linears, bns = init_params(key_p, input_size, expected_size, config["layers"])

    # One-time preprocessing (BN fold + padding + slab packing), reused per call.
    params = jax.tree_util.tree_map(jax.block_until_ready, prepare_params(linears, bns))

    out = mlp_forward(x, params, batch_tile=512)
    out = jax.block_until_ready(out)

    ref = mlp_reference(x, linears, bns)
    assert out.shape == (batch, expected_size)
    # bf16 MXU operands + bf16 output + BN folding -> loosened tolerance.
    assert jnp.allclose(out, ref, atol=5e-2, rtol=5e-2), "mismatch vs pure-JAX reference"

    print("KERNEL_OK")
</pallas_src>

<mosaic_0001>
module attributes {stable_mosaic.version = 11 : i64} {
  func.func @_mlp_kernel(%arg0: i32, %arg1: memref<512x128xbf16, #tpu.memory_space<vmem>>, %arg2: memref<5x128x128xbf16, #tpu.memory_space<vmem>>, %arg3: memref<5x1x128xf32, #tpu.memory_space<vmem>>, %arg4: memref<512x128xbf16, #tpu.memory_space<vmem>>) attributes {dimension_semantics = [#tpu.dimension_semantics<parallel>], iteration_bounds = array<i64: 2>, scalar_prefetch = 0 : i64, scratch_operands = 0 : i64, tpu.core_type = #tpu.core_type<tc>, window_params = [{transform_indices = @transform_0, window_bounds = array<i64: 512, 128>}, {pipeline_mode = #tpu.pipeline_mode<synchronous>, transform_indices = @transform_1, window_bounds = array<i64: 5, 128, 128>}, {pipeline_mode = #tpu.pipeline_mode<synchronous>, transform_indices = @transform_2, window_bounds = array<i64: 5, 1, 128>}, {transform_indices = @transform_3, window_bounds = array<i64: 512, 128>}]} {
    %c0 = arith.constant 0 : index
    %c0_0 = arith.constant 0 : index
    %0 = vector.load %arg1[%c0, %c0_0] : memref<512x128xbf16, #tpu.memory_space<vmem>>, vector<512x128xbf16>
    %c0_1 = arith.constant 0 : index
    %c0_2 = arith.constant 0 : index
    %c0_3 = arith.constant 0 : index
    %1 = vector.load %arg2[%c0_1, %c0_2, %c0_3] : memref<5x128x128xbf16, #tpu.memory_space<vmem>>, vector<1x128x128xbf16>
    %2 = vector.shape_cast %1 : vector<1x128x128xbf16> to vector<128x128xbf16>
    %cst = arith.constant dense<0.000000e+00> : vector<512x128xf32>
    %3 = tpu.matmul %0, %2, %cst {dimension_numbers = #tpu.dot_dimension_numbers<[1], [0], [0], [1], [0, 0, 1, 1], [], []>} : vector<512x128xbf16>, vector<128x128xbf16>, vector<512x128xf32> -> vector<512x128xf32>
    %c0_4 = arith.constant 0 : index
    %c0_5 = arith.constant 0 : index
    %c0_6 = arith.constant 0 : index
    %4 = vector.load %arg3[%c0_4, %c0_5, %c0_6] : memref<5x1x128xf32, #tpu.memory_space<vmem>>, vector<1x1x128xf32>
    %5 = vector.shape_cast %4 : vector<1x1x128xf32> to vector<1x128xf32>
    %6 = vector.broadcast %5 : vector<1x128xf32> to vector<512x128xf32>
    %7 = arith.addf %3, %6 : vector<512x128xf32>
    %cst_7 = arith.constant 0.00999999977 : f32
    %8 = vector.broadcast %cst_7 : f32 to vector<512x128xf32>
    %9 = arith.mulf %8, %7 : vector<512x128xf32>
    %10 = arith.maximumf %7, %9 : vector<512x128xf32>
    %11 = arith.truncf %10 : vector<512x128xf32> to vector<512x128xbf16>
    %c1 = arith.constant 1 : index
    %c0_8 = arith.constant 0 : index
    %c0_9 = arith.constant 0 : index
    %12 = vector.load %arg2[%c1, %c0_8, %c0_9] : memref<5x128x128xbf16, #tpu.memory_space<vmem>>, vector<1x128x128xbf16>
    %13 = vector.shape_cast %12 : vector<1x128x128xbf16> to vector<128x128xbf16>
    %cst_10 = arith.constant dense<0.000000e+00> : vector<512x128xf32>
    %14 = tpu.matmul %11, %13, %cst_10 {dimension_numbers = #tpu.dot_dimension_numbers<[1], [0], [0], [1], [0, 0, 1, 1], [], []>} : vector<512x128xbf16>, vector<128x128xbf16>, vector<512x128xf32> -> vector<512x128xf32>
    %c1_11 = arith.constant 1 : index
    %c0_12 = arith.constant 0 : index
    %c0_13 = arith.constant 0 : index
    %15 = vector.load %arg3[%c1_11, %c0_12, %c0_13] : memref<5x1x128xf32, #tpu.memory_space<vmem>>, vector<1x1x128xf32>
    %16 = vector.shape_cast %15 : vector<1x1x128xf32> to vector<1x128xf32>
    %17 = vector.broadcast %16 : vector<1x128xf32> to vector<512x128xf32>
    %18 = arith.addf %14, %17 : vector<512x128xf32>
    %cst_14 = arith.constant 0.00999999977 : f32
    %19 = vector.broadcast %cst_14 : f32 to vector<512x128xf32>
    %20 = arith.mulf %19, %18 : vector<512x128xf32>
    %21 = arith.maximumf %18, %20 : vector<512x128xf32>
    %22 = arith.truncf %21 : vector<512x128xf32> to vector<512x128xbf16>
    %c2 = arith.constant 2 : index
    %c0_15 = arith.constant 0 : index
    %c0_16 = arith.constant 0 : index
    %23 = vector.load %arg2[%c2, %c0_15, %c0_16] : memref<5x128x128xbf16, #tpu.memory_space<vmem>>, vector<1x128x128xbf16>
    %24 = vector.shape_cast %23 : vector<1x128x128xbf16> to vector<128x128xbf16>
    %cst_17 = arith.constant dense<0.000000e+00> : vector<512x128xf32>
    %25 = tpu.matmul %22, %24, %cst_17 {dimension_numbers = #tpu.dot_dimension_numbers<[1], [0], [0], [1], [0, 0, 1, 1], [], []>} : vector<512x128xbf16>, vector<128x128xbf16>, vector<512x128xf32> -> vector<512x128xf32>
    %c2_18 = arith.constant 2 : index
    %c0_19 = arith.constant 0 : index
    %c0_20 = arith.constant 0 : index
    %26 = vector.load %arg3[%c2_18, %c0_19, %c0_20] : memref<5x1x128xf32, #tpu.memory_space<vmem>>, vector<1x1x128xf32>
    %27 = vector.shape_cast %26 : vector<1x1x128xf32> to vector<1x128xf32>
    %28 = vector.broadcast %27 : vector<1x128xf32> to vector<512x128xf32>
    %29 = arith.addf %25, %28 : vector<512x128xf32>
    %cst_21 = arith.constant 0.00999999977 : f32
    %30 = vector.broadcast %cst_21 : f32 to vector<512x128xf32>
    %31 = arith.mulf %30, %29 : vector<512x128xf32>
    %32 = arith.maximumf %29, %31 : vector<512x128xf32>
    %33 = arith.truncf %32 : vector<512x128xf32> to vector<512x128xbf16>
    %c3 = arith.constant 3 : index
    %c0_22 = arith.constant 0 : index
    %c0_23 = arith.constant 0 : index
    %34 = vector.load %arg2[%c3, %c0_22, %c0_23] : memref<5x128x128xbf16, #tpu.memory_space<vmem>>, vector<1x128x128xbf16>
    %35 = vector.shape_cast %34 : vector<1x128x128xbf16> to vector<128x128xbf16>
    %cst_24 = arith.constant dense<0.000000e+00> : vector<512x128xf32>
    %36 = tpu.matmul %33, %35, %cst_24 {dimension_numbers = #tpu.dot_dimension_numbers<[1], [0], [0], [1], [0, 0, 1, 1], [], []>} : vector<512x128xbf16>, vector<128x128xbf16>, vector<512x128xf32> -> vector<512x128xf32>
    %c3_25 = arith.constant 3 : index
    %c0_26 = arith.constant 0 : index
    %c0_27 = arith.constant 0 : index
    %37 = vector.load %arg3[%c3_25, %c0_26, %c0_27] : memref<5x1x128xf32, #tpu.memory_space<vmem>>, vector<1x1x128xf32>
    %38 = vector.shape_cast %37 : vector<1x1x128xf32> to vector<1x128xf32>
    %39 = vector.broadcast %38 : vector<1x128xf32> to vector<512x128xf32>
    %40 = arith.addf %36, %39 : vector<512x128xf32>
    %cst_28 = arith.constant 0.00999999977 : f32
    %41 = vector.broadcast %cst_28 : f32 to vector<512x128xf32>
    %42 = arith.mulf %41, %40 : vector<512x128xf32>
    %43 = arith.maximumf %40, %42 : vector<512x128xf32>
    %44 = arith.truncf %43 : vector<512x128xf32> to vector<512x128xbf16>
    %c4 = arith.constant 4 : index
    %c0_29 = arith.constant 0 : index
    %c0_30 = arith.constant 0 : index
    %45 = vector.load %arg2[%c4, %c0_29, %c0_30] : memref<5x128x128xbf16, #tpu.memory_space<vmem>>, vector<1x128x128xbf16>
    %46 = vector.shape_cast %45 : vector<1x128x128xbf16> to vector<128x128xbf16>
    %cst_31 = arith.constant dense<0.000000e+00> : vector<512x128xf32>
    %47 = tpu.matmul %44, %46, %cst_31 {dimension_numbers = #tpu.dot_dimension_numbers<[1], [0], [0], [1], [0, 0, 1, 1], [], []>} : vector<512x128xbf16>, vector<128x128xbf16>, vector<512x128xf32> -> vector<512x128xf32>
    %c4_32 = arith.constant 4 : index
    %c0_33 = arith.constant 0 : index
    %c0_34 = arith.constant 0 : index
    %48 = vector.load %arg3[%c4_32, %c0_33, %c0_34] : memref<5x1x128xf32, #tpu.memory_space<vmem>>, vector<1x1x128xf32>
    %49 = vector.shape_cast %48 : vector<1x1x128xf32> to vector<1x128xf32>
    %50 = vector.broadcast %49 : vector<1x128xf32> to vector<512x128xf32>
    %51 = arith.addf %47, %50 : vector<512x128xf32>
    %52 = arith.truncf %51 : vector<512x128xf32> to vector<512x128xbf16>
    %c0_35 = arith.constant 0 : index
    %c0_36 = arith.constant 0 : index
    %53 = vector.load %arg4[%c0_35, %c0_36] : memref<512x128xbf16, #tpu.memory_space<vmem>>, vector<512x128xbf16>
    tpu.vector_store %arg4[%c0_35, %c0_36], %52 {strides = array<i32>} : memref<512x128xbf16, #tpu.memory_space<vmem>>, vector<512x128xbf16>,
    return
  }
  func.func @transform_0(%arg0: i32) -> (i32, i32) {
    %c0_i32 = arith.constant 0 : i32
    %c0_i32_0 = arith.constant 0 : i32
    return %arg0, %c0_i32 : i32, i32
  }
  func.func @transform_1(%arg0: i32) -> (i32, i32, i32) {
    %c0_i32 = arith.constant 0 : i32
    %c0_i32_0 = arith.constant 0 : i32
    %c0_i32_1 = arith.constant 0 : i32
    %c0_i32_2 = arith.constant 0 : i32
    return %c0_i32, %c0_i32_0, %c0_i32_1 : i32, i32, i32
  }
  func.func @transform_2(%arg0: i32) -> (i32, i32, i32) {
    %c0_i32 = arith.constant 0 : i32
    %c0_i32_0 = arith.constant 0 : i32
    %c0_i32_1 = arith.constant 0 : i32
    %c0_i32_2 = arith.constant 0 : i32
    return %c0_i32, %c0_i32_0, %c0_i32_1 : i32, i32, i32
  }
  func.func @transform_3(%arg0: i32) -> (i32, i32) {
    %c0_i32 = arith.constant 0 : i32
    %c0_i32_0 = arith.constant 0 : i32
    return %arg0, %c0_i32 : i32, i32
  }
}

</mosaic_0001>

<bundles_post_ra>
// kernel: tpu_custom_call.1
= control target key start
LH: loop header
LB: loop body
LE: loop exit
PB: predicated region body
PF: predicated region fallthrough
CT: control target
= control target key end

     0   :  { %8 = vsyncpa [#allocation3], 0  ;;  %s5313_s0 = inlined_call_operand.hbm [shape: bf16[1024,128], index: 0, kind: input, shape index: {}]   ;;  %s5314_s1 = inlined_call_operand.hbm [shape: bf16[5,128,128], index: 1, kind: input, shape index: {}]   ;;  %s5315_s2 = inlined_call_operand.vmem [shape: f32[5,1,128], index: 2, kind: input, shape index: {}]   ;;  %s5316_s3 = inlined_call_operand.hbm [shape: bf16[1024,128], index: 3, kind: output, shape index: {}]  }
   0x1   :  { %10 = vsyncpa [#allocation3 + $0x1], 0 }
   0x2   :  { %11 = vsyncpa [#allocation6], 0 }
   0x3   :  { %12 = vsyncpa [#allocation4], 0 }
   0x4   :  { %14 = vsyncpa [#allocation4 + $0x1], 0  ;;  %s4652_s12 = smov 0   ;;  %s4654_s13 = smov 0  }
   0x5   :  { %s4656_s14 = smov 0   ;;  %s4658_s15 = smov 0  }
   0x6 LB: > { %s4673_s16 = sadd.s32 4294967295, %s4623_s15   ;;  %s3328_s17 = sadd.s32 4294967294, %s4623_s15   ;;  %s4623_s15 = sphi %s4658_s15, %s5336_s15   ;;  %s4619_s14 = sphi %s4656_s14, %s5335_s14   ;;  %s4615_s13 = sphi %s4654_s13, %s5334_s13   ;;  %s4611_s12 = sphi %s4652_s12, %s5333_s12  }
   0x7   : > { %p40_p0 = scmp.ne.s32.totalorder %s4615_s13, %s4611_s12  ;;  %p5317_p1 = scmp.eq.s32.totalorder %s4673_s16, 0 }
   0x8   : > { %p112_p3 = scmp.eq.s32.totalorder %s3328_s17, 1  ;;  %p3329_p5 = scmp.ge.s32.totalorder %s4623_s15, 1 }
   0x9   : > { %p4682_p4 = por %p5317_p1, %p40_p0  ;;  %p119_p7 = scmp.lt.s32.totalorder %s4623_s15, 3 }
   0xa   : > { %p4687_p6 = por %p112_p3, %p40_p0  ;;  %s4625_s21 = smov [#allocation5]  }
   0xb   : > { %s5320_s18 = scalar_select %p4682_p4, 1, 0 }
   0xc   : > { %s5321_s19 = scalar_select %p4687_p6, 1, 0 }
   0xd   : > { %p4692_p8 = pnand %p3329_p5, %p119_p7  ;;  %s131_s22 = sshll.u32 %s4625_s21, 4  ;;  %s4696_s22 = int_to_ptr.vmem [resolvable:$true] %s131_s22 }
   0xe   : > { %s4708_s24 = sadd.s32 1, %s4623_s15   ;;  %s27_s25 = sadd.s32 1, %s4619_s14 }
   0xf   : > { %s5322_s20 = scalar_select %p4692_p8, 1, 0 }
  0x10   : > { %p4370_p9 = pneg %p4692_p8  ;;  %s24_s26 = ssub.s32 %s4623_s15, %s4708_s24 }
  0x11   : > { %s4495_s29 = scalar_lea.hbm %s5314_s1, 5120 }
  0x12   : > { %p4703_p11 = pnand %p4370_p9, %p5317_p1  ;;  %p4496_p12 = scmp.ne.s32.totalorder %s5314_s1, %s4495_s29 }
  0x13   : > { %p4502_p5 = scmp.lt.u32.totalorder %s4495_s29, %s5314_s1 }
  0x14   : > { %p4497_p13 = pneg %p4703_p11 }
  0x16   : > { %p4498_p0 = pnand %p4497_p13, %p4496_p12 }
  0x18   : > { %p4499_p3 = pneg %p4498_p0 }
  0x1a   : > { %p4504_p7 = pnand %p4502_p5, %p4499_p3 }
  0x1c   : > { %4507 = shalt.err (!%p4504_p7)
}
  0x1d   : > { %s4508_s7 = scalar_lea.vmem %s4696_s22, 5120  ;;  %p4516_p2 = scmp.lt.s32.totalorder %s4696_s22, %s4696_s22 }
  0x1e   : > { %p4509_p9 = scmp.ne.s32.totalorder %s4696_s22, %s4508_s7  ;;  %p4517_p6 = scmp.lt.s32.totalorder %s4508_s7, %s4508_s7 }
  0x20   : > { %p4511_p10 = pnand %p4509_p9, %p4497_p13  ;;  %p4518_p4 = por %p4517_p6, %p4516_p2 }
  0x22   : > { %p4512_p1 = pneg %p4511_p10 }
  0x24   : > { %p4519_p8 = pnand %p4518_p4, %p4512_p1 }
  0x26   : > { %4522 = shalt.err (!%p4519_p8)
}
  0x27   : > { %s4626_s8 = smov 64   ;;  %s4627_s9 = smov 4  }
  0x28   : > { %4373 = dma.hbm_to_vmem [thread:$0]  (!%p4703_p11), %s5314_s1, 5120, %s4696_s22, [#allocation6], %s4626_s8, %s4626_s8, %s4627_s9  }
  0x29   : > { %p25_p1 = scmp.eq.s32.totalorder %s24_s26, 0  ;;  %p34_p2 = scmp.ne.s32.totalorder %s4619_s14, %s4615_s13 }
  0x2a   : > { %p35_p4 = scmp.eq.s32.totalorder %s4623_s15, 0  ;;  %p4383_p6 = scmp.lt.s32.totalorder %s4623_s15, 2 }
  0x2b   : > { %s4742_s17 = scalar_select %p25_p1, %s4619_s14, %s27_s25  }
  0x2c   : > { %p36_p8 = por %p35_p4, %p34_p2  ;;  %p5324_p10 = scmp.eq.s32.totalorder %s4673_s16, 1 }
  0x2d   : > { %s148_s23 = sand.u32 1, %s4619_s14   ;;  %s3489_s27 = sshll.u32 %s4623_s15, 12 }
  0x2e   : > { %p4746_p12 = por %p5324_p10, %p34_p2  ;;  %s3332_s28 = sshll.u32 %s148_s23, 8 }
  0x2f   : > { %s4755_s4 = scalar_lea.hbm %s5313_s0, %s3489_s27  ;;  %s152_s22 = scalar_lea.vmem [#allocation2], %s3332_s28 }
  0x30   : > { %s159_s25 = sshll.u32 %s152_s22, 4  ;;  %p4757_p11 = pnand %p4383_p6, %p36_p8  ;;  %s4761_s25 = int_to_ptr.vmem [resolvable:$true] %s159_s25 }
  0x31   : > { %s4763_s5 = scalar_lea.sflag [#allocation3], %s148_s23  ;;  %s4523_s6 = scalar_lea.hbm %s4755_s4, 4096 }
  0x32   : > { %p4524_p13 = scmp.ne.s32.totalorder %s4755_s4, %s4523_s6  ;;  %p4525_p0 = pneg %p4757_p11 }
  0x33   : > { %s4528_s11 = scalar_lea.hbm %s5313_s0, 8192  ;;  %p4529_p7 = scmp.lt.u32.totalorder %s4755_s4, %s5313_s0 }
  0x34   : > { %p4526_p3 = pnand %p4525_p0, %p4524_p13  ;;  %p4530_p9 = scmp.lt.u32.totalorder %s4528_s11, %s4523_s6 }
  0x35   : > { %p4532_p2 = scmp.lt.u32.totalorder %s4523_s6, %s4755_s4 }
  0x36   : > { %p4527_p5 = pneg %p4526_p3  ;;  %p4531_p1 = por %p4530_p9, %p4529_p7 }
  0x38   : > { %p4533_p4 = por %p4532_p2, %p4531_p1 }
  0x3a   : > { %p4534_p6 = pnand %p4533_p4, %p4527_p5 }
  0x3c   : > { %4537 = shalt.err (!%p4534_p6)
}
  0x3d   : > { %s4538_s23 = scalar_lea.vmem %s4761_s25, 4096  ;;  %s4628_s29 = smov [#allocation2]  }
  0x3e   : > { %p4539_p8 = scmp.ne.s32.totalorder %s4761_s25, %s4538_s23  ;;  %s4543_s30 = sshll.u32 %s4628_s29, 4  ;;  %s4544_s30 = int_to_ptr.vmem [resolvable:$false] %s4543_s30 }
  0x3f   : > { %s4545_s22 = scalar_lea.vmem %s4544_s30, 8192  ;;  %p4546_p3 = scmp.lt.s32.totalorder %s4761_s25, %s4544_s30 }
  0x40   : > { %p4541_p10 = pnand %p4539_p8, %p4525_p0  ;;  %p4547_p7 = scmp.lt.s32.totalorder %s4545_s22, %s4538_s23 }
  0x42   : > { %p4542_p13 = pneg %p4541_p10  ;;  %p4548_p9 = por %p4547_p7, %p4546_p3 }
  0x44   : > { %p4549_p1 = pnand %p4548_p9, %p4542_p13 }
  0x46   : > { %4552 = shalt.err (!%p4549_p1)
}
  0x47   : > { %4377 = dma.hbm_to_vmem [thread:$0]  (!%p4757_p11), %s4755_s4, 4096, %s4761_s25, %s4763_s5, %s4626_s8, %s4626_s8, %s4627_s9  }
  0x48   : > { %p5327_p0 = scmp.ne.s32.totalorder %s5322_s20, 0 }
  0x49   : > { %s4797_s6 = sand.u32 (!%p5327_p0), 1, %s4615_s13   ;;  %p5328_p5 = scmp.ne.s32.totalorder (!%p5327_p0), %s5320_s18, 0 }
  0x4a   : > { %171 = sbr.rel (%p5327_p0) target bundleno = 1368 (0x558), region = 32  ;;  %s3336_s7 = sshll.u32 (!%p5327_p0), %s4797_s6, 8 }
  0x4b   : > { %s174_s10 = scalar_lea.sflag (!%p5327_p0), [#allocation3], %s4797_s6  ;;  %s4803_s26 = scalar_lea.vmem (!%p5327_p0), [#allocation2], %s3336_s7 }
  0x51   : > { %4598 = dma.done.wait (%p5328_p5), %s174_s10, 4096  }
  0x52   : > { %4600 = vsyncadd (%p5328_p5), %s174_s10, 4294963200  ;;  %p5329_p11 = scmp.eq.s32.totalorder %s4673_s16, 0 }
  0x54   : > { %4602 = dma.done.wait (%p5329_p11), [#allocation6], 5120   ;;  %p5330_p2 = pmov %p5329_p11 }
  0x55   : > { %v4423_v0 = vld [vmem:[#allocation5] sm:$0xff]   ;;  %v4424_v1 = vld [vmem:[#allocation5 + $0x8] sm:$0xff]   ;;  %v4425_v2 = vld [vmem:[#allocation5 + $0x10] sm:$0xff]   ;;  %s5168_s23 = scalar_lea.vmem [#allocation7], %s3336_s7  ;;  %s3554_s29 = sshll.u32 %s4673_s16, 12 }
  0x56   : > { %4604 = vsyncadd (%p5330_p2), [#allocation6], 4294962176  ;;  %3946 = vmatprep.subr.bf16.mxu0 %v4423_v0  ;;  %4346 = vmatprep.subr.bf16.mxu1 %v4423_v0  ;;  %v4426_v3 = vld [vmem:[#allocation5 + $0x18] sm:$0xff]   ;;  %v4431_v4 = vld [vmem:[%s4803_s26] sm:$0xff]   ;;  %s3245_s30 = sshll.u32 %s5168_s23, 4  ;;  %s5265_s10 = scalar_lea.hbm %s5316_s3, %s3554_s29  ;;  %s5267_s30 = int_to_ptr.vmem [resolvable:$true] %s3245_s30 }
  0x57   : > { %3947 = vmatpush3.bf16.msra.mxu0 %v4423_v0  ;;  %4354 = vmatpush3.bf16.msra.mxu1 %v4423_v0  ;;  %v4427_v5 = vld [vmem:[#allocation5 + $0x20] sm:$0xff]   ;;  %v4428_v6 = vld [vmem:[#allocation5 + $0x28] sm:$0xff]   ;;  %v4429_v7 = vld [vmem:[#allocation5 + $0x30] sm:$0xff]   ;;  %s3232_s16 = scalar_lea.sflag [#allocation4], %s4797_s6  ;;  %s4629_s18 = smov [#allocation7]  }
  0x58   : > { %3948 = vmatprep.subr.bf16.mxu0 %v4424_v1  ;;  %4347 = vmatprep.subr.bf16.mxu1 %v4424_v1  ;;  %v4430_v8 = vld [vmem:[#allocation5 + $0x38] sm:$0xff]   ;;  %v4447_v9 = vld [vmem:[%s4803_s26 + $0x80] sm:$0xff]   ;;  %v4432_v10 = vld [vmem:[%s4803_s26 + $0x8] sm:$0xff]   ;;  %s4557_s20 = sshll.u32 %s4629_s18, 4  ;;  %s4558_s20 = int_to_ptr.vmem [resolvable:$false] %s4557_s20 }
  0x59   : > { %3962 = vmatprep.mubr.bf16.mxu0 %v4431_v4  ;;  %3994 = vmatprep.mubr.bf16.mxu1 %v4447_v9  ;;  %v4433_v11 = vld [vmem:[%s4803_s26 + $0x10] sm:$0xff]   ;;  %v4448_v12 = vld [vmem:[%s4803_s26 + $0x88] sm:$0xff]   ;;  %v4434_v14 = vld [vmem:[%s4803_s26 + $0x18] sm:$0xff]   ;;  %s4559_s8 = scalar_lea.vmem %s4558_s20, 8192  ;;  %p4560_p10 = scmp.lt.s32.totalorder %s5267_s30, %s4558_s20 }
  0x5a   : > { %v4449_v13 = vld [vmem:[%s4803_s26 + $0x90] sm:$0xff]   ;;  %v4435_v15 = vld [vmem:[%s4803_s26 + $0x20] sm:$0xff]   ;;  %v4450_v16 = vld [vmem:[%s4803_s26 + $0x98] sm:$0xff]  }
  0x5b   : > { %3949 = vmatpush3.bf16.msra.mxu0 %v4424_v1  ;;  %4355 = vmatpush3.bf16.msra.mxu1 %v4424_v1  ;;  %v4451_v17 = vld [vmem:[%s4803_s26 + $0xa0] sm:$0xff]   ;;  %v4464_v19 = vld [vmem:[#allocation5 + $0x48] sm:$0xff]   ;;  %v4437_v22 = vld [vmem:[%s4803_s26 + $0x30] sm:$0xff]  }
  0x5c   : > { %3950 = vmatprep.subr.bf16.mxu0 %v4425_v2  ;;  %4348 = vmatprep.subr.bf16.mxu1 %v4425_v2  ;;  %v4463_v18 = vld [vmem:[#allocation5 + $0x40] sm:$0xff]   ;;  %v4436_v20 = vld [vmem:[%s4803_s26 + $0x28] sm:$0xff]   ;;  %v4453_v23 = vld [vmem:[%s4803_s26 + $0xb0] sm:$0xff]  }
  0x5d   : > { %v4452_v21 = vld [vmem:[%s4803_s26 + $0xa8] sm:$0xff]   ;;  %v4465_v24 = vld [vmem:[#allocation5 + $0x50] sm:$0xff]   ;;  %v4466_v25 = vld [vmem:[#allocation5 + $0x58] sm:$0xff]  }
  0x5e   : > { %v4438_v26 = vld [vmem:[%s4803_s26 + $0x38] sm:$0xff]   ;;  %v4439_v28 = vld [vmem:[%s4803_s26 + $0x40] sm:$0xff]   ;;  %v4468_v31 = vld [vmem:[#allocation5 + $0x68] sm:$0xff]  }
  0x5f   : > { %3951 = vmatpush3.bf16.msra.mxu0 %v4425_v2  ;;  %4356 = vmatpush3.bf16.msra.mxu1 %v4425_v2  ;;  %v4454_v27 = vld [vmem:[%s4803_s26 + $0xb8] sm:$0xff]   ;;  %v4455_v29 = vld [vmem:[%s4803_s26 + $0xc0] sm:$0xff]   ;;  %v4440_v32 = vld [vmem:[%s4803_s26 + $0x48] sm:$0xff]  }
  0x60   : > { %3952 = vmatprep.subr.bf16.mxu0 %v4426_v3  ;;  %4349 = vmatprep.subr.bf16.mxu1 %v4426_v3  ;;  %v4467_v30 = vld [vmem:[#allocation5 + $0x60] sm:$0xff]   ;;  %v4456_v33 = vld [vmem:[%s4803_s26 + $0xc8] sm:$0xff]   ;;  %v4441_v34 = vld [vmem:[%s4803_s26 + $0x50] sm:$0xff]  }
  0x61   : > { %v4457_v35 = vld [vmem:[%s4803_s26 + $0xd0] sm:$0xff]   ;;  %v4442_v37 = vld [vmem:[%s4803_s26 + $0x58] sm:$0xff]   ;;  %v4443_v39 = vld [vmem:[%s4803_s26 + $0x60] sm:$0xff]  }
  0x62   : > { %v4469_v36 = vld [vmem:[#allocation5 + $0x70] sm:$0xff]   ;;  %v4458_v38 = vld [vmem:[%s4803_s26 + $0xd8] sm:$0xff]   ;;  %v4459_v40 = vld [vmem:[%s4803_s26 + $0xe0] sm:$0xff]  }
  0x63   : > { %3953 = vmatpush3.bf16.msra.mxu0 %v4426_v3  ;;  %4357 = vmatpush3.bf16.msra.mxu1 %v4426_v3  ;;  %v4444_v41 = vld [vmem:[%s4803_s26 + $0x68] sm:$0xff]   ;;  %v4445_v43 = vld [vmem:[%s4803_s26 + $0x70] sm:$0xff]   ;;  %v4446_v45 = vld [vmem:[%s4803_s26 + $0x78] sm:$0xff]  }
  0x64   : > { %3954 = vmatprep.subr.bf16.mxu0 %v4427_v5  ;;  %4350 = vmatprep.subr.bf16.mxu1 %v4427_v5  ;;  %v4460_v42 = vld [vmem:[%s4803_s26 + $0xe8] sm:$0xff]   ;;  %v4461_v44 = vld [vmem:[%s4803_s26 + $0xf0] sm:$0xff]   ;;  %v4462_v46 = vld [vmem:[%s4803_s26 + $0xf8] sm:$0xff]   ;;  %s4553_s26 = scalar_lea.vmem %s5267_s30, 4096 }
  0x65   : > { %v4470_v47 = vld [vmem:[#allocation5 + $0x78] sm:$0xff]   ;;  %v4848_v48 = vld [vmem:[%s5315_s2] ss:$0 sm:$0xff]  ;;  %v4472_v9 = vld [vmem:[#allocation5 + $0x88] sm:$0xff]   ;;  %p4554_p4 = scmp.ne.s32.totalorder %s5267_s30, %s4553_s26  ;;  %p4561_p13 = scmp.lt.s32.totalorder %s4559_s8, %s4553_s26 }
  0x67   : > { %3955 = vmatpush3.bf16.msra.mxu0 %v4427_v5  ;;  %4358 = vmatpush3.bf16.msra.mxu1 %v4427_v5  ;;  %p4555_p6 = pnand %p4554_p4, %p4746_p12  ;;  %p4562_p3 = por %p4561_p13, %p4560_p10 }
  0x68   : > { %3956 = vmatprep.subr.bf16.mxu0 %v4428_v6  ;;  %4351 = vmatprep.subr.bf16.mxu1 %v4428_v6 }
  0x69   : > { %p4556_p8 = pneg %p4555_p6 }
  0x6b   : > { %3957 = vmatpush3.bf16.msra.mxu0 %v4428_v6  ;;  %4359 = vmatpush3.bf16.msra.mxu1 %v4428_v6  ;;  %p4563_p7 = pnand %p4562_p3, %p4556_p8 }
  0x6c   : > { %3958 = vmatprep.subr.bf16.mxu0 %v4429_v7  ;;  %4352 = vmatprep.subr.bf16.mxu1 %v4429_v7 }
  0x6f   : > { %3959 = vmatpush3.bf16.msra.mxu0 %v4429_v7  ;;  %4360 = vmatpush3.bf16.msra.mxu1 %v4429_v7 }
  0x70   : > { %3960 = vmatprep.subr.bf16.mxu0 %v4430_v8  ;;  %4353 = vmatprep.subr.bf16.mxu1 %v4430_v8 }
  0x73   : > { %3961 = vmatpush3.bf16.msra.mxu0 %v4430_v8  ;;  %4361 = vmatpush3.bf16.msra.mxu1 %v4430_v8  ;;  %v4471_v8 = vld [vmem:[#allocation5 + $0x80] sm:$0xff]  }
  0x74   : > { %4026 = vmatprep.subr.bf16.mxu1 %v4463_v18  ;;  %4106 = vmatprep.subr.bf16.mxu0 %v4471_v8 }
  0x76   : > { %3963 = vmatmul.mubr.bf16.vlgmr.msra.gmra.mrb[0].mxu0 %v4432_v10  ;;  %3995 = vmatmul.mubr.bf16.vlgmr.msra.gmra.mrb[0].mxu1 %v4448_v12 }
  0x77   : > { %3966 = vmatprep.mubr.bf16.mxu0 %v4433_v11  ;;  %3998 = vmatprep.mubr.bf16.mxu1 %v4449_v13 }
  0x78   : > { %4027 = vmatpush3.bf16.msra.mxu1 %v4463_v18  ;;  %4107 = vmatpush3.bf16.msra.mxu0 %v4471_v8 }
  0x79   : > { %4028 = vmatprep.subr.bf16.mxu1 %v4464_v19  ;;  %4108 = vmatprep.subr.bf16.mxu0 %v4472_v9 }
  0x7c   : > { %4029 = vmatpush3.bf16.msra.mxu1 %v4464_v19  ;;  %4109 = vmatpush3.bf16.msra.mxu0 %v4472_v9 }
  0x7d   : > { %4030 = vmatprep.subr.bf16.mxu1 %v4465_v24 }
  0x7e   : > { %3967 = vmatmul.mubr.bf16.gmra.mrb[4].mxu0 %v4434_v14  ;;  %3999 = vmatmul.mubr.bf16.gmra.mrb[4].mxu1 %v4450_v16 }
  0x7f   : > { %3970 = vmatprep.mubr.bf16.mxu0 %v4435_v15  ;;  %4002 = vmatprep.mubr.bf16.mxu1 %v4451_v17 }
  0x80   : > { %4031 = vmatpush3.bf16.msra.mxu1 %v4465_v24 }
  0x81   : > { %4032 = vmatprep.subr.bf16.mxu1 %v4466_v25 }
  0x84   : > { %4033 = vmatpush3.bf16.msra.mxu1 %v4466_v25 }
  0x85   : > { %4034 = vmatprep.subr.bf16.mxu1 %v4467_v30 }
  0x86   : > { %3971 = vmatmul.mubr.bf16.gmra.mrb[8].mxu0 %v4436_v20  ;;  %4003 = vmatmul.mubr.bf16.gmra.mrb[8].mxu1 %v4452_v21 }
  0x87   : > { %3974 = vmatprep.mubr.bf16.mxu0 %v4437_v22  ;;  %4006 = vmatprep.mubr.bf16.mxu1 %v4453_v23 }
  0x88   : > { %4035 = vmatpush3.bf16.msra.mxu1 %v4467_v30 }
  0x89   : > { %4036 = vmatprep.subr.bf16.mxu1 %v4468_v31 }
  0x8c   : > { %4037 = vmatpush3.bf16.msra.mxu1 %v4468_v31 }
  0x8d   : > { %4038 = vmatprep.subr.bf16.mxu1 %v4469_v36 }
  0x8e   : > { %3975 = vmatmul.mubr.bf16.gmra.mrb[12].mxu0 %v4438_v26  ;;  %4007 = vmatmul.mubr.bf16.gmra.mrb[12].mxu1 %v4454_v27  ;;  %v4473_v27 = vld [vmem:[#allocation5 + $0x90] sm:$0xff]  }
  0x8f   : > { %3978 = vmatprep.mubr.bf16.mxu0 %v4439_v28  ;;  %4010 = vmatprep.mubr.bf16.mxu1 %v4455_v29 }
  0x90   : > { %4039 = vmatpush3.bf16.msra.mxu1 %v4469_v36  ;;  %4110 = vmatprep.subr.bf16.mxu0 %v4473_v27 }
  0x91   : > { %4040 = vmatprep.subr.bf16.mxu1 %v4470_v47  ;;  %4111 = vmatpush3.bf16.msra.mxu0 %v4473_v27 }
  0x94   : > { %4041 = vmatpush3.bf16.msra.mxu1 %v4470_v47  ;;  %v4474_v47 = vld [vmem:[#allocation5 + $0x98] sm:$0xff]  }
  0x95   : > { %4112 = vmatprep.subr.bf16.mxu0 %v4474_v47 }
  0x96   : > { %3979 = vmatmul.mubr.bf16.gmra.mrb[16].mxu0 %v4440_v32  ;;  %4011 = vmatmul.mubr.bf16.gmra.mrb[16].mxu1 %v4456_v33 }
  0x97   : > { %3982 = vmatprep.mubr.bf16.mxu0 %v4441_v34  ;;  %4014 = vmatprep.mubr.bf16.mxu1 %v4457_v35 }
  0x98   : > { %4113 = vmatpush3.bf16.msra.mxu0 %v4474_v47 }
  0x9e   : > { %3983 = vmatmul.mubr.bf16.gmra.mrb[20].mxu0 %v4442_v37  ;;  %4015 = vmatmul.mubr.bf16.gmra.mrb[20].mxu1 %v4458_v38 }
  0x9f   : > { %3986 = vmatprep.mubr.bf16.mxu0 %v4443_v39  ;;  %4018 = vmatprep.mubr.bf16.mxu1 %v4459_v40 }
  0xa6   : > { %3987 = vmatmul.mubr.bf16.gmra.mrb[24].mxu0 %v4444_v41  ;;  %4019 = vmatmul.mubr.bf16.gmra.mrb[24].mxu1 %v4460_v42 }
  0xa7   : > { %3990 = vmatprep.mubr.bf16.mxu0 %v4445_v43  ;;  %4022 = vmatprep.mubr.bf16.mxu1 %v4461_v44 }
  0xae   : > { %3991 = vmatmul.mubr.bf16.gmra.mrb[28].mxu0 %v4446_v45  ;;  %4023 = vmatmul.mubr.bf16.gmra.mrb[28].mxu1 %v4462_v46 }
 0x149   : > { %v3964_v49 = vpop.f32.mrb[0].mxu0  ;;  %v3996_v50 = vpop.f32.mrb[0].mxu1 }
 0x14a   : > { %v577_v51 = vadd.f32 %v3964_v49, %v4848_v48  ;;  %v568_v52 = vpop.f32.mrb[1].mxu0  ;;  %v705_v53 = vadd.f32 %v3996_v50, %v4848_v48  ;;  %v696_v54 = vpop.f32.mrb[1].mxu1 }
 0x14b   : > { %v569_v55 = vadd.f32 %v4848_v48, %v568_v52  ;;  %v3965_v56 = vpop.f32.mrb[2].mxu0  ;;  %v697_v57 = vadd.f32 %v4848_v48, %v696_v54  ;;  %v3997_v58 = vpop.f32.mrb[2].mxu1 }
 0x14c   : > { %v825_v59 = vmul.f32 0.01, %v577_v51  ;;  %v580_v60 = vadd.f32 %v3965_v56, %v4848_v48  ;;  %v571_v61 = vpop.f32.mrb[3].mxu0  ;;  %v857_v62 = vmul.f32 0.01, %v705_v53  ;;  %v708_v63 = vadd.f32 %v3997_v58, %v4848_v48  ;;  %v699_v0 = vpop.f32.mrb[3].mxu1 }
 0x14d   : > { %v823_v1 = vmul.f32 0.01, %v569_v55  ;;  %v572_v2 = vadd.f32 %v4848_v48, %v571_v61  ;;  %v855_v3 = vmul.f32 0.01, %v697_v57  ;;  %v700_v4 = vadd.f32 %v4848_v48, %v699_v0 }
 0x14e   : > { %v826_v5 = vmul.f32 0.01, %v580_v60  ;;  %v921_v6 = vmax.f32 %v705_v53, %v857_v62  ;;  %v858_v7 = vmul.f32 0.01, %v708_v63  ;;  %v889_v13 = vmax.f32 %v577_v51, %v825_v59 }
 0x14f   : > { %v824_v10 = vmul.f32 0.01, %v572_v2  ;;  %v919_v11 = vmax.f32 %v697_v57, %v855_v3  ;;  %v856_v12 = vmul.f32 0.01, %v700_v4  ;;  %v887_v16 = vmax.f32 %v569_v55, %v823_v1 }
 0x150   : > { %v890_v14 = vmax.f32 %v580_v60, %v826_v5  ;;  %v922_v15 = vmax.f32 %v708_v63, %v858_v7 }
 0x151   : > { %v888_v17 = vmax.f32 %v572_v2, %v824_v10  ;;  %v3968_v18 = vpop.f32.mrb[4].mxu0  ;;  %v920_v19 = vmax.f32 %v700_v4, %v856_v12  ;;  %v4000_v20 = vpop.f32.mrb[4].mxu1  ;;  %v4475_v2 = vld [vmem:[#allocation5 + $0xa0] sm:$0xff]  }
 0x152   : > { %v952_v21 = vpack.c.bf16 %v890_v14, %v889_v13  ;;  %v593_v22 = vadd.f32 %v3968_v18, %v4848_v48  ;;  %v584_v23 = vpop.f32.mrb[5].mxu0  ;;  %v721_v24 = vadd.f32 %v4000_v20, %v4848_v48  ;;  %v712_v25 = vpop.f32.mrb[5].mxu1  ;;  %v4860_v26 = vpack.c.bf16 %v922_v15, %v921_v6  ;;  %4114 = vmatprep.subr.bf16.mxu0 %v4475_v2 }
 0x153   : > { %v585_v28 = vadd.f32 %v4848_v48, %v584_v23  ;;  %v3969_v29 = vpop.f32.mrb[6].mxu0  ;;  %v951_v30 = vpack.c.bf16 %v888_v17, %v887_v16  ;;  %v713_v31 = vadd.f32 %v4848_v48, %v712_v25  ;;  %v4001_v32 = vpop.f32.mrb[6].mxu1  ;;  %v4864_v33 = vpack.c.bf16 %v920_v19, %v919_v11  ;;  %4115 = vmatpush3.bf16.msra.mxu0 %v4475_v2 }
 0x154   : > { %v829_v34 = vmul.f32 0.01, %v593_v22  ;;  %v596_v35 = vadd.f32 %v3969_v29, %v4848_v48  ;;  %v587_v36 = vpop.f32.mrb[7].mxu0  ;;  %v861_v37 = vmul.f32 0.01, %v721_v24  ;;  %v724_v38 = vadd.f32 %v4001_v32, %v4848_v48  ;;  %v715_v39 = vpop.f32.mrb[7].mxu1 }
 0x155   : > { %v827_v40 = vmul.f32 0.01, %v585_v28  ;;  %v588_v41 = vadd.f32 %v4848_v48, %v587_v36  ;;  %4042 = vmatprep.mubr.bf16.mxu1 %v951_v30  ;;  %v859_v42 = vmul.f32 0.01, %v713_v31  ;;  %v716_v43 = vadd.f32 %v4848_v48, %v715_v39 }
 0x156   : > { %v830_v44 = vmul.f32 0.01, %v596_v35  ;;  %4043 = vmatmul.mubr.bf16.vlgmr.msra.gmra.mrb[32].mxu1 %v952_v21  ;;  %v925_v45 = vmax.f32 %v721_v24, %v861_v37  ;;  %v862_v46 = vmul.f32 0.01, %v724_v38  ;;  %v893_v52 = vmax.f32 %v593_v22, %v829_v34  ;;  %v4476_v22 = vld [vmem:[#allocation5 + $0xa8] sm:$0xff]  }
 0x157   : > { %v828_v49 = vmul.f32 0.01, %v588_v41  ;;  %v923_v50 = vmax.f32 %v713_v31, %v859_v42  ;;  %v860_v51 = vmul.f32 0.01, %v716_v43  ;;  %v891_v55 = vmax.f32 %v585_v28, %v827_v40  ;;  %4116 = vmatprep.subr.bf16.mxu0 %v4476_v22  ;;  %v4477_v42 = vld [vmem:[#allocation5 + $0xb0] sm:$0xff]  }
 0x158   : > { %v894_v53 = vmax.f32 %v596_v35, %v830_v44  ;;  %v926_v54 = vmax.f32 %v724_v38, %v862_v46  ;;  %4117 = vmatpush3.bf16.msra.mxu0 %v4476_v22 }
 0x159   : > { %v892_v56 = vmax.f32 %v588_v41, %v828_v49  ;;  %v3972_v57 = vpop.f32.mrb[8].mxu0  ;;  %v924_v58 = vmax.f32 %v716_v43, %v860_v51  ;;  %v4004_v59 = vpop.f32.mrb[8].mxu1  ;;  %4118 = vmatprep.subr.bf16.mxu0 %v4477_v42 }
 0x15a   : > { %v609_v60 = vadd.f32 %v3972_v57, %v4848_v48  ;;  %v600_v61 = vpop.f32.mrb[9].mxu0  ;;  %v954_v62 = vpack.c.bf16 %v894_v53, %v893_v52  ;;  %v737_v63 = vadd.f32 %v4004_v59, %v4848_v48  ;;  %v728_v0 = vpop.f32.mrb[9].mxu1  ;;  %v4872_v1 = vpack.c.bf16 %v926_v54, %v925_v45 }
 0x15b   : > { %v601_v3 = vadd.f32 %v4848_v48, %v600_v61  ;;  %v3973_v4 = vpop.f32.mrb[10].mxu0  ;;  %v953_v5 = vpack.c.bf16 %v892_v56, %v891_v55  ;;  %v729_v6 = vadd.f32 %v4848_v48, %v728_v0  ;;  %v4005_v7 = vpop.f32.mrb[10].mxu1  ;;  %v4876_v8 = vpack.c.bf16 %v924_v58, %v923_v50 }
 0x15c   : > { %v833_v9 = vmul.f32 0.01, %v609_v60  ;;  %v612_v10 = vadd.f32 %v3973_v4, %v4848_v48  ;;  %v603_v11 = vpop.f32.mrb[11].mxu0  ;;  %v865_v12 = vmul.f32 0.01, %v737_v63  ;;  %v740_v13 = vadd.f32 %v4005_v7, %v4848_v48  ;;  %v731_v14 = vpop.f32.mrb[11].mxu1  ;;  %4119 = vmatpush3.bf16.msra.mxu0 %v4477_v42 }
 0x15d   : > { %v831_v15 = vmul.f32 0.01, %v601_v3  ;;  %v604_v16 = vadd.f32 %v4848_v48, %v603_v11  ;;  %4046 = vmatprep.mubr.bf16.mxu1 %v953_v5  ;;  %v863_v17 = vmul.f32 0.01, %v729_v6  ;;  %v732_v18 = vadd.f32 %v4848_v48, %v731_v14 }
 0x15e   : > { %v834_v19 = vmul.f32 0.01, %v612_v10  ;;  %4047 = vmatmul.mubr.bf16.gmra.mrb[36].mxu1 %v954_v62  ;;  %v929_v20 = vmax.f32 %v737_v63, %v865_v12  ;;  %v866_v21 = vmul.f32 0.01, %v740_v13  ;;  %v897_v27 = vmax.f32 %v609_v60, %v833_v9 }
 0x15f   : > { %v832_v23 = vmul.f32 0.01, %v604_v16  ;;  %v927_v24 = vmax.f32 %v729_v6, %v863_v17  ;;  %v864_v25 = vmul.f32 0.01, %v732_v18  ;;  %v895_v30 = vmax.f32 %v601_v3, %v831_v15 }
 0x160   : > { %v898_v28 = vmax.f32 %v612_v10, %v834_v19  ;;  %v930_v29 = vmax.f32 %v740_v13, %v866_v21 }
 0x161   : > { %v896_v31 = vmax.f32 %v604_v16, %v832_v23  ;;  %v3976_v32 = vpop.f32.mrb[12].mxu0  ;;  %v928_v34 = vmax.f32 %v732_v18, %v864_v25  ;;  %v4008_v35 = vpop.f32.mrb[12].mxu1 }
 0x162   : > { %v625_v36 = vadd.f32 %v3976_v32, %v4848_v48  ;;  %v616_v37 = vpop.f32.mrb[13].mxu0  ;;  %v956_v38 = vpack.c.bf16 %v898_v28, %v897_v27  ;;  %v753_v39 = vadd.f32 %v4008_v35, %v4848_v48  ;;  %v744_v40 = vpop.f32.mrb[13].mxu1  ;;  %v4884_v41 = vpack.c.bf16 %v930_v29, %v929_v20 }
 0x163   : > { %v617_v43 = vadd.f32 %v4848_v48, %v616_v37  ;;  %v3977_v44 = vpop.f32.mrb[14].mxu0  ;;  %v955_v45 = vpack.c.bf16 %v896_v31, %v895_v30  ;;  %v745_v46 = vadd.f32 %v4848_v48, %v744_v40  ;;  %v4009_v47 = vpop.f32.mrb[14].mxu1  ;;  %v4888_v49 = vpack.c.bf16 %v928_v34, %v927_v24 }
 0x164   : > { %v837_v50 = vmul.f32 0.01, %v625_v36  ;;  %v628_v51 = vadd.f32 %v3977_v44, %v4848_v48  ;;  %v619_v52 = vpop.f32.mrb[15].mxu0  ;;  %v869_v53 = vmul.f32 0.01, %v753_v39  ;;  %v756_v54 = vadd.f32 %v4009_v47, %v4848_v48  ;;  %v747_v55 = vpop.f32.mrb[15].mxu1 }
 0x165   : > { %v835_v56 = vmul.f32 0.01, %v617_v43  ;;  %v620_v57 = vadd.f32 %v4848_v48, %v619_v52  ;;  %4050 = vmatprep.mubr.bf16.mxu1 %v955_v45  ;;  %v867_v58 = vmul.f32 0.01, %v745_v46  ;;  %v748_v59 = vadd.f32 %v4848_v48, %v747_v55 }
 0x166   : > { %v838_v60 = vmul.f32 0.01, %v628_v51  ;;  %4051 = vmatmul.mubr.bf16.gmra.mrb[40].mxu1 %v956_v38  ;;  %v933_v61 = vmax.f32 %v753_v39, %v869_v53  ;;  %v870_v62 = vmul.f32 0.01, %v756_v54  ;;  %v901_v3 = vmax.f32 %v625_v36, %v837_v50 }
 0x167   : > { %v836_v63 = vmul.f32 0.01, %v620_v57  ;;  %v931_v0 = vmax.f32 %v745_v46, %v867_v58  ;;  %v868_v2 = vmul.f32 0.01, %v748_v59  ;;  %v899_v6 = vmax.f32 %v617_v43, %v835_v56 }
 0x168   : > { %v902_v4 = vmax.f32 %v628_v51, %v838_v60  ;;  %v934_v5 = vmax.f32 %v756_v54, %v870_v62 }
 0x169   : > { %v900_v7 = vmax.f32 %v620_v57, %v836_v63  ;;  %v3980_v9 = vpop.f32.mrb[16].mxu0  ;;  %v932_v10 = vmax.f32 %v748_v59, %v868_v2  ;;  %v4012_v11 = vpop.f32.mrb[16].mxu1 }
 0x16a   : > { %v641_v12 = vadd.f32 %v3980_v9, %v4848_v48  ;;  %v632_v13 = vpop.f32.mrb[17].mxu0  ;;  %v958_v14 = vpack.c.bf16 %v902_v4, %v901_v3  ;;  %v769_v15 = vadd.f32 %v4012_v11, %v4848_v48  ;;  %v760_v16 = vpop.f32.mrb[17].mxu1  ;;  %v4896_v17 = vpack.c.bf16 %v934_v5, %v933_v61 }
 0x16b   : > { %v633_v18 = vadd.f32 %v4848_v48, %v632_v13  ;;  %v3981_v19 = vpop.f32.mrb[18].mxu0  ;;  %v957_v20 = vpack.c.bf16 %v900_v7, %v899_v6  ;;  %v761_v21 = vadd.f32 %v4848_v48, %v760_v16  ;;  %v4013_v22 = vpop.f32.mrb[18].mxu1  ;;  %v4900_v23 = vpack.c.bf16 %v932_v10, %v931_v0 }
 0x16c   : > { %v841_v24 = vmul.f32 0.01, %v641_v12  ;;  %v644_v25 = vadd.f32 %v3981_v19, %v4848_v48  ;;  %v635_v27 = vpop.f32.mrb[19].mxu0  ;;  %v873_v28 = vmul.f32 0.01, %v769_v15  ;;  %v772_v29 = vadd.f32 %v4013_v22, %v4848_v48  ;;  %v763_v30 = vpop.f32.mrb[19].mxu1 }
 0x16d   : > { %v839_v31 = vmul.f32 0.01, %v633_v18  ;;  %v636_v32 = vadd.f32 %v4848_v48, %v635_v27  ;;  %4054 = vmatprep.mubr.bf16.mxu1 %v957_v20  ;;  %v871_v34 = vmul.f32 0.01, %v761_v21  ;;  %v764_v35 = vadd.f32 %v4848_v48, %v763_v30 }
 0x16e   : > { %v842_v36 = vmul.f32 0.01, %v644_v25  ;;  %4055 = vmatmul.mubr.bf16.gmra.mrb[44].mxu1 %v958_v14  ;;  %v937_v37 = vmax.f32 %v769_v15, %v873_v28  ;;  %v874_v38 = vmul.f32 0.01, %v772_v29  ;;  %v905_v43 = vmax.f32 %v641_v12, %v841_v24 }
 0x16f   : > { %v840_v39 = vmul.f32 0.01, %v636_v32  ;;  %v935_v40 = vmax.f32 %v761_v21, %v871_v34  ;;  %v872_v42 = vmul.f32 0.01, %v764_v35  ;;  %v903_v46 = vmax.f32 %v633_v18, %v839_v31 }
 0x170   : > { %v906_v44 = vmax.f32 %v644_v25, %v842_v36  ;;  %v938_v45 = vmax.f32 %v772_v29, %v874_v38 }
 0x171   : > { %v904_v47 = vmax.f32 %v636_v32, %v840_v39  ;;  %v3984_v50 = vpop.f32.mrb[20].mxu0  ;;  %v936_v51 = vmax.f32 %v764_v35, %v872_v42  ;;  %v4016_v52 = vpop.f32.mrb[20].mxu1 }
 0x172   : > { %v657_v53 = vadd.f32 %v3984_v50, %v4848_v48  ;;  %v648_v54 = vpop.f32.mrb[21].mxu0  ;;  %v960_v55 = vpack.c.bf16 %v906_v44, %v905_v43  ;;  %v785_v56 = vadd.f32 %v4016_v52, %v4848_v48  ;;  %v776_v57 = vpop.f32.mrb[21].mxu1  ;;  %v4908_v58 = vpack.c.bf16 %v938_v45, %v937_v37 }
 0x173   : > { %v649_v59 = vadd.f32 %v4848_v48, %v648_v54  ;;  %v3985_v60 = vpop.f32.mrb[22].mxu0  ;;  %v959_v61 = vpack.c.bf16 %v904_v47, %v903_v46  ;;  %v777_v62 = vadd.f32 %v4848_v48, %v776_v57  ;;  %v4017_v63 = vpop.f32.mrb[22].mxu1  ;;  %v4912_v0 = vpack.c.bf16 %v936_v51, %v935_v40 }
 0x174   : > { %v845_v2 = vmul.f32 0.01, %v657_v53  ;;  %v660_v3 = vadd.f32 %v3985_v60, %v4848_v48  ;;  %v651_v4 = vpop.f32.mrb[23].mxu0  ;;  %v877_v5 = vmul.f32 0.01, %v785_v56  ;;  %v788_v6 = vadd.f32 %v4017_v63, %v4848_v48  ;;  %v779_v7 = vpop.f32.mrb[23].mxu1 }
 0x175   : > { %v843_v9 = vmul.f32 0.01, %v649_v59  ;;  %v652_v10 = vadd.f32 %v4848_v48, %v651_v4  ;;  %4058 = vmatprep.mubr.bf16.mxu1 %v959_v61  ;;  %v875_v11 = vmul.f32 0.01, %v777_v62  ;;  %v780_v12 = vadd.f32 %v4848_v48, %v779_v7 }
 0x176   : > { %v846_v13 = vmul.f32 0.01, %v660_v3  ;;  %4059 = vmatmul.mubr.bf16.gmra.mrb[48].mxu1 %v960_v55  ;;  %v941_v14 = vmax.f32 %v785_v56, %v877_v5  ;;  %v878_v15 = vmul.f32 0.01, %v788_v6  ;;  %v909_v20 = vmax.f32 %v657_v53, %v845_v2 }
 0x177   : > { %v844_v16 = vmul.f32 0.01, %v652_v10  ;;  %v939_v18 = vmax.f32 %v777_v62, %v875_v11  ;;  %v876_v19 = vmul.f32 0.01, %v780_v12  ;;  %v907_v24 = vmax.f32 %v649_v59, %v843_v9 }
 0x178   : > { %v910_v21 = vmax.f32 %v660_v3, %v846_v13  ;;  %v942_v22 = vmax.f32 %v788_v6, %v878_v15 }
 0x179   : > { %v908_v25 = vmax.f32 %v652_v10, %v844_v16  ;;  %v3988_v27 = vpop.f32.mrb[24].mxu0  ;;  %v940_v28 = vmax.f32 %v780_v12, %v876_v19  ;;  %v4020_v29 = vpop.f32.mrb[24].mxu1 }
 0x17a   : > { %v673_v30 = vadd.f32 %v3988_v27, %v4848_v48  ;;  %v664_v31 = vpop.f32.mrb[25].mxu0  ;;  %v962_v32 = vpack.c.bf16 %v910_v21, %v909_v20  ;;  %v801_v34 = vadd.f32 %v4020_v29, %v4848_v48  ;;  %v792_v35 = vpop.f32.mrb[25].mxu1  ;;  %v4920_v36 = vpack.c.bf16 %v942_v22, %v941_v14 }
 0x17b   : > { %v665_v37 = vadd.f32 %v4848_v48, %v664_v31  ;;  %v3989_v38 = vpop.f32.mrb[26].mxu0  ;;  %v961_v39 = vpack.c.bf16 %v908_v25, %v907_v24  ;;  %v793_v40 = vadd.f32 %v4848_v48, %v792_v35  ;;  %v4021_v42 = vpop.f32.mrb[26].mxu1  ;;  %v4924_v43 = vpack.c.bf16 %v940_v28, %v939_v18 }
 0x17c   : > { %v849_v44 = vmul.f32 0.01, %v673_v30  ;;  %v676_v45 = vadd.f32 %v3989_v38, %v4848_v48  ;;  %v667_v46 = vpop.f32.mrb[27].mxu0  ;;  %v881_v47 = vmul.f32 0.01, %v801_v34  ;;  %v804_v50 = vadd.f32 %v4021_v42, %v4848_v48  ;;  %v795_v51 = vpop.f32.mrb[27].mxu1 }
 0x17d   : > { %v847_v52 = vmul.f32 0.01, %v665_v37  ;;  %v668_v53 = vadd.f32 %v4848_v48, %v667_v46  ;;  %4062 = vmatprep.mubr.bf16.mxu1 %v961_v39  ;;  %v879_v54 = vmul.f32 0.01, %v793_v40  ;;  %v796_v55 = vadd.f32 %v4848_v48, %v795_v51 }
 0x17e   : > { %v850_v56 = vmul.f32 0.01, %v676_v45  ;;  %4063 = vmatmul.mubr.bf16.gmra.mrb[52].mxu1 %v962_v32  ;;  %v945_v57 = vmax.f32 %v801_v34, %v881_v47  ;;  %v882_v59 = vmul.f32 0.01, %v804_v50  ;;  %v913_v63 = vmax.f32 %v673_v30, %v849_v44 }
 0x17f   : > { %v848_v60 = vmul.f32 0.01, %v668_v53  ;;  %v943_v61 = vmax.f32 %v793_v40, %v879_v54  ;;  %v880_v62 = vmul.f32 0.01, %v796_v55  ;;  %v911_v4 = vmax.f32 %v665_v37, %v847_v52 }
 0x180   : > { %v914_v2 = vmax.f32 %v676_v45, %v850_v56  ;;  %v946_v3 = vmax.f32 %v804_v50, %v882_v59 }
 0x181   : > { %v912_v5 = vmax.f32 %v668_v53, %v848_v60  ;;  %v3992_v6 = vpop.f32.mrb[28].mxu0  ;;  %v944_v7 = vmax.f32 %v796_v55, %v880_v62  ;;  %v4024_v9 = vpop.f32.mrb[28].mxu1  ;;  %v4481_v60 = vld [vmem:[#allocation5 + $0xd0] sm:$0xff]  }
 0x182   : > { %v689_v10 = vadd.f32 %v3992_v6, %v4848_v48  ;;  %v680_v11 = vpop.f32.mrb[29].mxu0  ;;  %v964_v12 = vpack.c.bf16 %v914_v2, %v913_v63  ;;  %v817_v13 = vadd.f32 %v4024_v9, %v4848_v48  ;;  %v808_v14 = vpop.f32.mrb[29].mxu1  ;;  %v980_v15 = vpack.c.bf16 %v946_v3, %v945_v57 }
 0x183   : > { %v681_v16 = vadd.f32 %v4848_v48, %v680_v11  ;;  %v3993_v18 = vpop.f32.mrb[30].mxu0  ;;  %v963_v19 = vpack.c.bf16 %v912_v5, %v911_v4  ;;  %v809_v20 = vadd.f32 %v4848_v48, %v808_v14  ;;  %v4025_v21 = vpop.f32.mrb[30].mxu1  ;;  %v979_v22 = vpack.c.bf16 %v944_v7, %v943_v61  ;;  %v4482_v61 = vld [vmem:[#allocation5 + $0xd8] sm:$0xff]  }
 0x184   : > { %v853_v24 = vmul.f32 0.01, %v689_v10  ;;  %v692_v25 = vadd.f32 %v3993_v18, %v4848_v48  ;;  %v683_v27 = vpop.f32.mrb[31].mxu0  ;;  %v885_v28 = vmul.f32 0.01, %v817_v13  ;;  %v820_v29 = vadd.f32 %v4025_v21, %v4848_v48  ;;  %v811_v30 = vpop.f32.mrb[31].mxu1 }
 0x185   : > { %v851_v31 = vmul.f32 0.01, %v681_v16  ;;  %v684_v32 = vadd.f32 %v4848_v48, %v683_v27  ;;  %4066 = vmatprep.mubr.bf16.mxu1 %v963_v19  ;;  %v883_v34 = vmul.f32 0.01, %v809_v20  ;;  %v812_v35 = vadd.f32 %v4848_v48, %v811_v30  ;;  %v4478_v48 = vld [vmem:[#allocation5 + $0xb8] sm:$0xff]   ;;  %v4484_v21 = vld [vmem:[#allocation5 + $0xe8] sm:$0xff]  }
 0x186   : > { %v854_v37 = vmul.f32 0.01, %v692_v25  ;;  %4067 = vmatmul.mubr.bf16.gmra.mrb[56].mxu1 %v964_v12  ;;  %v949_v38 = vmax.f32 %v817_v13, %v885_v28  ;;  %v886_v39 = vmul.f32 0.01, %v820_v29  ;;  %v917_v45 = vmax.f32 %v689_v10, %v853_v24  ;;  %4120 = vmatprep.subr.bf16.mxu0 %v4478_v48  ;;  %v4483_v10 = vld [vmem:[#allocation5 + $0xe0] sm:$0xff]  }
 0x187   : > { %v852_v40 = vmul.f32 0.01, %v684_v32  ;;  %v947_v42 = vmax.f32 %v809_v20, %v883_v34  ;;  %v884_v44 = vmul.f32 0.01, %v812_v35  ;;  %v915_v50 = vmax.f32 %v681_v16, %v851_v31  ;;  %4121 = vmatpush3.bf16.msra.mxu0 %v4478_v48  ;;  %v4485_v34 = vld [vmem:[#allocation5 + $0xf0] sm:$0xff]  }
 0x188   : > { %v918_v46 = vmax.f32 %v692_v25, %v854_v37  ;;  %v950_v47 = vmax.f32 %v820_v29, %v886_v39 }
 0x189   : > { %v916_v51 = vmax.f32 %v684_v32, %v852_v40  ;;  %v948_v52 = vmax.f32 %v812_v35, %v884_v44 }
 0x18a   : > { %v966_v53 = vpack.c.bf16 %v918_v46, %v917_v45  ;;  %v982_v54 = vpack.c.bf16 %v950_v47, %v949_v38  ;;  %v4486_v47 = vld [vmem:[#allocation5 + $0xf8] sm:$0xff]  }
 0x18b   : > { %v965_v55 = vpack.c.bf16 %v916_v51, %v915_v50  ;;  %v981_v56 = vpack.c.bf16 %v948_v52, %v947_v42 }
 0x18d   : > { %4070 = vmatprep.mubr.bf16.mxu1 %v965_v55 }
 0x18e   : > { %4071 = vmatmul.mubr.bf16.gmra.mrb[60].mxu1 %v966_v53 }
 0x18f   : > { %4074 = vmatprep.mubr.bf16.mxu1 %v4864_v33  ;;  %v4953_v33 = vld [vmem:[%s5315_s2 + $0x1] ss:$0 sm:$0xff] }
 0x196   : > { %4075 = vmatmul.mubr.bf16.gmra.mrb[64].mxu1 %v4860_v26  ;;  %v4479_v26 = vld [vmem:[#allocation5 + $0xc0] sm:$0xff]  }
 0x197   : > { %4078 = vmatprep.mubr.bf16.mxu1 %v4876_v8  ;;  %4186 = vmatprep.subr.bf16.mxu1 %v4479_v26  ;;  %v4480_v8 = vld [vmem:[#allocation5 + $0xc8] sm:$0xff]  }
 0x198   : > { %4187 = vmatpush3.bf16.msra.mxu1 %v4479_v26 }
 0x199   : > { %4188 = vmatprep.subr.bf16.mxu1 %v4480_v8 }
 0x19c   : > { %4189 = vmatpush3.bf16.msra.mxu1 %v4480_v8 }
 0x19d   : > { %4190 = vmatprep.subr.bf16.mxu1 %v4481_v60 }
 0x19e   : > { %4079 = vmatmul.mubr.bf16.gmra.mrb[68].mxu1 %v4872_v1 }
 0x19f   : > { %4082 = vmatprep.mubr.bf16.mxu1 %v4888_v49 }
 0x1a0   : > { %4191 = vmatpush3.bf16.msra.mxu1 %v4481_v60 }
 0x1a1   : > { %4192 = vmatprep.subr.bf16.mxu1 %v4482_v61 }
 0x1a4   : > { %4193 = vmatpush3.bf16.msra.mxu1 %v4482_v61 }
 0x1a5   : > { %4194 = vmatprep.subr.bf16.mxu1 %v4483_v10 }
 0x1a6   : > { %4083 = vmatmul.mubr.bf16.gmra.mrb[72].mxu1 %v4884_v41 }
 0x1a7   : > { %4086 = vmatprep.mubr.bf16.mxu1 %v4900_v23 }
 0x1a8   : > { %4195 = vmatpush3.bf16.msra.mxu1 %v4483_v10 }
 0x1a9   : > { %4196 = vmatprep.subr.bf16.mxu1 %v4484_v21 }
 0x1ac   : > { %4197 = vmatpush3.bf16.msra.mxu1 %v4484_v21 }
 0x1ad   : > { %4198 = vmatprep.subr.bf16.mxu1 %v4485_v34 }
 0x1ae   : > { %4087 = vmatmul.mubr.bf16.gmra.mrb[76].mxu1 %v4896_v17 }
 0x1af   : > { %4090 = vmatprep.mubr.bf16.mxu1 %v4912_v0 }
 0x1b0   : > { %4199 = vmatpush3.bf16.msra.mxu1 %v4485_v34 }
 0x1b1   : > { %4200 = vmatprep.subr.bf16.mxu1 %v4486_v47 }
 0x1b4   : > { %4201 = vmatpush3.bf16.msra.mxu1 %v4486_v47 }
 0x1b6   : > { %4091 = vmatmul.mubr.bf16.gmra.mrb[80].mxu1 %v4908_v58 }
 0x1b7   : > { %4094 = vmatprep.mubr.bf16.mxu1 %v4924_v43 }
 0x1be   : > { %4095 = vmatmul.mubr.bf16.gmra.mrb[84].mxu1 %v4920_v36 }
 0x1bf   : > { %4098 = vmatprep.mubr.bf16.mxu1 %v979_v22 }
 0x1c6   : > { %4099 = vmatmul.mubr.bf16.gmra.mrb[88].mxu1 %v980_v15 }
 0x1c7   : > { %4102 = vmatprep.mubr.bf16.mxu1 %v981_v56 }
 0x1ce   : > { %4103 = vmatmul.mubr.bf16.gmra.mrb[92].mxu1 %v982_v54 }
 0x229   : > { %v4044_v1 = vpop.f32.mrb[32].mxu1 }
 0x22a   : > { %v1099_v41 = vadd.f32 %v4044_v1, %v4953_v33  ;;  %v1090_v49 = vpop.f32.mrb[33].mxu1 }
 0x22b   : > { %v1091_v17 = vadd.f32 %v4953_v33, %v1090_v49  ;;  %v4045_v23 = vpop.f32.mrb[34].mxu1 }
 0x22c   : > { %v1347_v58 = vmul.f32 0.01, %v1099_v41  ;;  %v1102_v0 = vadd.f32 %v4045_v23, %v4953_v33  ;;  %v1093_v36 = vpop.f32.mrb[35].mxu1 }
 0x22d   : > { %v1345_v43 = vmul.f32 0.01, %v1091_v17  ;;  %v1094_v57 = vadd.f32 %v4953_v33, %v1093_v36 }
 0x22e   : > { %v1348_v59 = vmul.f32 0.01, %v1102_v0  ;;  %v1411_v63 = vmax.f32 %v1099_v41, %v1347_v58 }
 0x22f   : > { %v1346_v62 = vmul.f32 0.01, %v1094_v57  ;;  %v1409_v3 = vmax.f32 %v1091_v17, %v1345_v43 }
 0x230   : > { %v1412_v2 = vmax.f32 %v1102_v0, %v1348_v59 }
 0x231   : > { %v1410_v4 = vmax.f32 %v1094_v57, %v1346_v62  ;;  %v4048_v5 = vpop.f32.mrb[36].mxu1 }
 0x232   : > { %v1474_v6 = vpack.c.bf16 %v1412_v2, %v1411_v63  ;;  %v1115_v7 = vadd.f32 %v4048_v5, %v4953_v33  ;;  %v1106_v9 = vpop.f32.mrb[37].mxu1 }
 0x233   : > { %v1107_v11 = vadd.f32 %v4953_v33, %v1106_v9  ;;  %v4049_v12 = vpop.f32.mrb[38].mxu1  ;;  %v1473_v13 = vpack.c.bf16 %v1410_v4, %v1409_v3 }
 0x234   : > { %v1351_v14 = vmul.f32 0.01, %v1115_v7  ;;  %v1118_v15 = vadd.f32 %v4049_v12, %v4953_v33  ;;  %v1109_v16 = vpop.f32.mrb[39].mxu1 }
 0x235   : > { %v1349_v18 = vmul.f32 0.01, %v1107_v11  ;;  %v1110_v19 = vadd.f32 %v4953_v33, %v1109_v16  ;;  %4122 = vmatprep.mubr.bf16.mxu0 %v1473_v13 }
 0x236   : > { %v1352_v20 = vmul.f32 0.01, %v1118_v15  ;;  %4123 = vmatmul.mubr.bf16.vlgmr.msra.gmra.mrb[32].mxu0 %v1474_v6  ;;  %v1415_v24 = vmax.f32 %v1115_v7, %v1351_v14 }
 0x237   : > { %v1350_v22 = vmul.f32 0.01, %v1110_v19  ;;  %v1413_v27 = vmax.f32 %v1107_v11, %v1349_v18 }
 0x238   : > { %v1416_v25 = vmax.f32 %v1118_v15, %v1352_v20 }
 0x239   : > { %v1414_v28 = vmax.f32 %v1110_v19, %v1350_v22  ;;  %v4052_v29 = vpop.f32.mrb[40].mxu1 }
 0x23a   : > { %v1131_v30 = vadd.f32 %v4052_v29, %v4953_v33  ;;  %v1122_v31 = vpop.f32.mrb[41].mxu1  ;;  %v1476_v32 = vpack.c.bf16 %v1416_v25, %v1415_v24 }
 0x23b   : > { %v1123_v35 = vadd.f32 %v4953_v33, %v1122_v31  ;;  %v4053_v37 = vpop.f32.mrb[42].mxu1  ;;  %v1475_v38 = vpack.c.bf16 %v1414_v28, %v1413_v27 }
 0x23c   : > { %v1355_v39 = vmul.f32 0.01, %v1131_v30  ;;  %v1134_v40 = vadd.f32 %v4053_v37, %v4953_v33  ;;  %v1125_v42 = vpop.f32.mrb[43].mxu1 }
 0x23d   : > { %v1353_v44 = vmul.f32 0.01, %v1123_v35  ;;  %v1126_v45 = vadd.f32 %v4953_v33, %v1125_v42  ;;  %4126 = vmatprep.mubr.bf16.mxu0 %v1475_v38 }
 0x23e   : > { %v1356_v46 = vmul.f32 0.01, %v1134_v40  ;;  %4127 = vmatmul.mubr.bf16.gmra.mrb[36].mxu0 %v1476_v32  ;;  %v1419_v51 = vmax.f32 %v1131_v30, %v1355_v39 }
 0x23f   : > { %v1354_v50 = vmul.f32 0.01, %v1126_v45  ;;  %v1417_v53 = vmax.f32 %v1123_v35, %v1353_v44 }
 0x240   : > { %v1420_v52 = vmax.f32 %v1134_v40, %v1356_v46 }
 0x241   : > { %v1418_v54 = vmax.f32 %v1126_v45, %v1354_v50  ;;  %v4056_v55 = vpop.f32.mrb[44].mxu1 }
 0x242   : > { %v1147_v56 = vadd.f32 %v4056_v55, %v4953_v33  ;;  %v1138_v48 = vpop.f32.mrb[45].mxu1  ;;  %v1478_v26 = vpack.c.bf16 %v1420_v52, %v1419_v51 }
 0x243   : > { %v1139_v1 = vadd.f32 %v4953_v33, %v1138_v48  ;;  %v4057_v8 = vpop.f32.mrb[46].mxu1  ;;  %v1477_v41 = vpack.c.bf16 %v1418_v54, %v1417_v53 }
 0x244   : > { %v1359_v49 = vmul.f32 0.01, %v1147_v56  ;;  %v1150_v17 = vadd.f32 %v4057_v8, %v4953_v33  ;;  %v1141_v23 = vpop.f32.mrb[47].mxu1 }
 0x245   : > { %v1357_v58 = vmul.f32 0.01, %v1139_v1  ;;  %v1142_v0 = vadd.f32 %v4953_v33, %v1141_v23  ;;  %4130 = vmatprep.mubr.bf16.mxu0 %v1477_v41 }
 0x246   : > { %v1360_v36 = vmul.f32 0.01, %v1150_v17  ;;  %4131 = vmatmul.mubr.bf16.gmra.mrb[40].mxu0 %v1478_v26  ;;  %v1423_v57 = vmax.f32 %v1147_v56, %v1359_v49 }
 0x247   : > { %v1358_v43 = vmul.f32 0.01, %v1142_v0  ;;  %v1421_v60 = vmax.f32 %v1139_v1, %v1357_v58 }
 0x248   : > { %v1424_v59 = vmax.f32 %v1150_v17, %v1360_v36 }
 0x249   : > { %v1422_v61 = vmax.f32 %v1142_v0, %v1358_v43  ;;  %v4060_v62 = vpop.f32.mrb[48].mxu1 }
 0x24a   : > { %v1163_v63 = vadd.f32 %v4060_v62, %v4953_v33  ;;  %v1154_v2 = vpop.f32.mrb[49].mxu1  ;;  %v1480_v3 = vpack.c.bf16 %v1424_v59, %v1423_v57 }
 0x24b   : > { %v1155_v4 = vadd.f32 %v4953_v33, %v1154_v2  ;;  %v4061_v5 = vpop.f32.mrb[50].mxu1  ;;  %v1479_v6 = vpack.c.bf16 %v1422_v61, %v1421_v60 }
 0x24c   : > { %v1363_v7 = vmul.f32 0.01, %v1163_v63  ;;  %v1166_v9 = vadd.f32 %v4061_v5, %v4953_v33  ;;  %v1157_v10 = vpop.f32.mrb[51].mxu1 }
 0x24d   : > { %v1361_v11 = vmul.f32 0.01, %v1155_v4  ;;  %v1158_v12 = vadd.f32 %v4953_v33, %v1157_v10  ;;  %4134 = vmatprep.mubr.bf16.mxu0 %v1479_v6 }
 0x24e   : > { %v1364_v13 = vmul.f32 0.01, %v1166_v9  ;;  %4135 = vmatmul.mubr.bf16.gmra.mrb[44].mxu0 %v1480_v3  ;;  %v1427_v15 = vmax.f32 %v1163_v63, %v1363_v7 }
 0x24f   : > { %v1362_v14 = vmul.f32 0.01, %v1158_v12  ;;  %v1425_v18 = vmax.f32 %v1155_v4, %v1361_v11 }
 0x250   : > { %v1428_v16 = vmax.f32 %v1166_v9, %v1364_v13 }
 0x251   : > { %v1426_v19 = vmax.f32 %v1158_v12, %v1362_v14  ;;  %v4064_v20 = vpop.f32.mrb[52].mxu1 }
 0x252   : > { %v1179_v21 = vadd.f32 %v4064_v20, %v4953_v33  ;;  %v1170_v22 = vpop.f32.mrb[53].mxu1  ;;  %v1482_v24 = vpack.c.bf16 %v1428_v16, %v1427_v15 }
 0x253   : > { %v1171_v25 = vadd.f32 %v4953_v33, %v1170_v22  ;;  %v4065_v27 = vpop.f32.mrb[54].mxu1  ;;  %v1481_v28 = vpack.c.bf16 %v1426_v19, %v1425_v18 }
 0x254   : > { %v1367_v29 = vmul.f32 0.01, %v1179_v21  ;;  %v1182_v30 = vadd.f32 %v4065_v27, %v4953_v33  ;;  %v1173_v31 = vpop.f32.mrb[55].mxu1 }
 0x255   : > { %v1365_v32 = vmul.f32 0.01, %v1171_v25  ;;  %v1174_v34 = vadd.f32 %v4953_v33, %v1173_v31  ;;  %4138 = vmatprep.mubr.bf16.mxu0 %v1481_v28 }
 0x256   : > { %v1368_v35 = vmul.f32 0.01, %v1182_v30  ;;  %4139 = vmatmul.mubr.bf16.gmra.mrb[48].mxu0 %v1482_v24  ;;  %v1431_v38 = vmax.f32 %v1179_v21, %v1367_v29 }
 0x257   : > { %v1366_v37 = vmul.f32 0.01, %v1174_v34  ;;  %v1429_v40 = vmax.f32 %v1171_v25, %v1365_v32 }
 0x258   : > { %v1432_v39 = vmax.f32 %v1182_v30, %v1368_v35 }
 0x259   : > { %v1430_v42 = vmax.f32 %v1174_v34, %v1366_v37  ;;  %v4068_v44 = vpop.f32.mrb[56].mxu1 }
 0x25a   : > { %v1195_v45 = vadd.f32 %v4068_v44, %v4953_v33  ;;  %v1186_v46 = vpop.f32.mrb[57].mxu1  ;;  %v1484_v47 = vpack.c.bf16 %v1432_v39, %v1431_v38 }
 0x25b   : > { %v1187_v50 = vadd.f32 %v4953_v33, %v1186_v46  ;;  %v4069_v51 = vpop.f32.mrb[58].mxu1  ;;  %v1483_v52 = vpack.c.bf16 %v1430_v42, %v1429_v40 }
 0x25c   : > { %v1371_v53 = vmul.f32 0.01, %v1195_v45  ;;  %v1198_v54 = vadd.f32 %v4069_v51, %v4953_v33  ;;  %v1189_v55 = vpop.f32.mrb[59].mxu1 }
 0x25d   : > { %v1369_v56 = vmul.f32 0.01, %v1187_v50  ;;  %v1190_v48 = vadd.f32 %v4953_v33, %v1189_v55  ;;  %4142 = vmatprep.mubr.bf16.mxu0 %v1483_v52 }
 0x25e   : > { %v1372_v26 = vmul.f32 0.01, %v1198_v54  ;;  %4143 = vmatmul.mubr.bf16.gmra.mrb[52].mxu0 %v1484_v47  ;;  %v1435_v8 = vmax.f32 %v1195_v45, %v1371_v53 }
 0x25f   : > { %v1370_v1 = vmul.f32 0.01, %v1190_v48  ;;  %v1433_v49 = vmax.f32 %v1187_v50, %v1369_v56 }
 0x260   : > { %v1436_v41 = vmax.f32 %v1198_v54, %v1372_v26 }
 0x261   : > { %v1434_v17 = vmax.f32 %v1190_v48, %v1370_v1  ;;  %v4072_v23 = vpop.f32.mrb[60].mxu1 }
 0x262   : > { %v1211_v58 = vadd.f32 %v4072_v23, %v4953_v33  ;;  %v1202_v0 = vpop.f32.mrb[61].mxu1  ;;  %v1486_v36 = vpack.c.bf16 %v1436_v41, %v1435_v8 }
 0x263   : > { %v1203_v43 = vadd.f32 %v4953_v33, %v1202_v0  ;;  %v4073_v57 = vpop.f32.mrb[62].mxu1  ;;  %v1485_v59 = vpack.c.bf16 %v1434_v17, %v1433_v49 }
 0x264   : > { %v1375_v60 = vmul.f32 0.01, %v1211_v58  ;;  %v1214_v61 = vadd.f32 %v4073_v57, %v4953_v33  ;;  %v1205_v62 = vpop.f32.mrb[63].mxu1 }
 0x265   : > { %v1373_v63 = vmul.f32 0.01, %v1203_v43  ;;  %v1206_v2 = vadd.f32 %v4953_v33, %v1205_v62  ;;  %4146 = vmatprep.mubr.bf16.mxu0 %v1485_v59 }
 0x266   : > { %v1376_v3 = vmul.f32 0.01, %v1214_v61  ;;  %4147 = vmatmul.mubr.bf16.gmra.mrb[56].mxu0 %v1486_v36  ;;  %v1439_v5 = vmax.f32 %v1211_v58, %v1375_v60 }
 0x267   : > { %v1374_v4 = vmul.f32 0.01, %v1206_v2  ;;  %v1437_v7 = vmax.f32 %v1203_v43, %v1373_v63 }
 0x268   : > { %v1440_v6 = vmax.f32 %v1214_v61, %v1376_v3 }
 0x269   : > { %v1438_v9 = vmax.f32 %v1206_v2, %v1374_v4  ;;  %v4076_v10 = vpop.f32.mrb[64].mxu1 }
 0x26a   : > { %v1227_v11 = vadd.f32 %v4076_v10, %v4953_v33  ;;  %v1218_v12 = vpop.f32.mrb[65].mxu1  ;;  %v1488_v13 = vpack.c.bf16 %v1440_v6, %v1439_v5 }
 0x26b   : > { %v1219_v14 = vadd.f32 %v4953_v33, %v1218_v12  ;;  %v4077_v15 = vpop.f32.mrb[66].mxu1  ;;  %v1487_v16 = vpack.c.bf16 %v1438_v9, %v1437_v7 }
 0x26c   : > { %v1379_v18 = vmul.f32 0.01, %v1227_v11  ;;  %v1230_v19 = vadd.f32 %v4077_v15, %v4953_v33  ;;  %v1221_v20 = vpop.f32.mrb[67].mxu1 }
 0x26d   : > { %v1377_v21 = vmul.f32 0.01, %v1219_v14  ;;  %v1222_v22 = vadd.f32 %v4953_v33, %v1221_v20  ;;  %4150 = vmatprep.mubr.bf16.mxu0 %v1487_v16 }
 0x26e   : > { %v1380_v24 = vmul.f32 0.01, %v1230_v19  ;;  %4151 = vmatmul.mubr.bf16.gmra.mrb[60].mxu0 %v1488_v13  ;;  %v1443_v27 = vmax.f32 %v1227_v11, %v1379_v18 }
 0x26f   : > { %v1378_v25 = vmul.f32 0.01, %v1222_v22  ;;  %v1441_v29 = vmax.f32 %v1219_v14, %v1377_v21 }
 0x270   : > { %v1444_v28 = vmax.f32 %v1230_v19, %v1380_v24 }
 0x271   : > { %v1442_v30 = vmax.f32 %v1222_v22, %v1378_v25  ;;  %v4080_v31 = vpop.f32.mrb[68].mxu1 }
 0x272   : > { %v1243_v32 = vadd.f32 %v4080_v31, %v4953_v33  ;;  %v1234_v34 = vpop.f32.mrb[69].mxu1  ;;  %v1490_v35 = vpack.c.bf16 %v1444_v28, %v1443_v27 }
 0x273   : > { %v1235_v37 = vadd.f32 %v4953_v33, %v1234_v34  ;;  %v4081_v38 = vpop.f32.mrb[70].mxu1  ;;  %v1489_v39 = vpack.c.bf16 %v1442_v30, %v1441_v29 }
 0x274   : > { %v1383_v40 = vmul.f32 0.01, %v1243_v32  ;;  %v1246_v42 = vadd.f32 %v4081_v38, %v4953_v33  ;;  %v1237_v44 = vpop.f32.mrb[71].mxu1 }
 0x275   : > { %v1381_v45 = vmul.f32 0.01, %v1235_v37  ;;  %v1238_v46 = vadd.f32 %v4953_v33, %v1237_v44  ;;  %4154 = vmatprep.mubr.bf16.mxu0 %v1489_v39 }
 0x276   : > { %v1384_v47 = vmul.f32 0.01, %v1246_v42  ;;  %4155 = vmatmul.mubr.bf16.gmra.mrb[64].mxu0 %v1490_v35  ;;  %v1447_v51 = vmax.f32 %v1243_v32, %v1383_v40 }
 0x277   : > { %v1382_v50 = vmul.f32 0.01, %v1238_v46  ;;  %v1445_v53 = vmax.f32 %v1235_v37, %v1381_v45 }
 0x278   : > { %v1448_v52 = vmax.f32 %v1246_v42, %v1384_v47 }
 0x279   : > { %v1446_v54 = vmax.f32 %v1238_v46, %v1382_v50  ;;  %v4084_v55 = vpop.f32.mrb[72].mxu1 }
 0x27a   : > { %v1259_v56 = vadd.f32 %v4084_v55, %v4953_v33  ;;  %v1250_v48 = vpop.f32.mrb[73].mxu1  ;;  %v1492_v26 = vpack.c.bf16 %v1448_v52, %v1447_v51 }
 0x27b   : > { %v1251_v1 = vadd.f32 %v4953_v33, %v1250_v48  ;;  %v4085_v8 = vpop.f32.mrb[74].mxu1  ;;  %v1491_v41 = vpack.c.bf16 %v1446_v54, %v1445_v53 }
 0x27c   : > { %v1387_v49 = vmul.f32 0.01, %v1259_v56  ;;  %v1262_v17 = vadd.f32 %v4085_v8, %v4953_v33  ;;  %v1253_v23 = vpop.f32.mrb[75].mxu1 }
 0x27d   : > { %v1385_v58 = vmul.f32 0.01, %v1251_v1  ;;  %v1254_v0 = vadd.f32 %v4953_v33, %v1253_v23  ;;  %4158 = vmatprep.mubr.bf16.mxu0 %v1491_v41 }
 0x27e   : > { %v1388_v36 = vmul.f32 0.01, %v1262_v17  ;;  %4159 = vmatmul.mubr.bf16.gmra.mrb[68].mxu0 %v1492_v26  ;;  %v1451_v57 = vmax.f32 %v1259_v56, %v1387_v49 }
 0x27f   : > { %v1386_v43 = vmul.f32 0.01, %v1254_v0  ;;  %v1449_v60 = vmax.f32 %v1251_v1, %v1385_v58 }
 0x280   : > { %v1452_v59 = vmax.f32 %v1262_v17, %v1388_v36 }
 0x281   : > { %v1450_v61 = vmax.f32 %v1254_v0, %v1386_v43  ;;  %v4088_v62 = vpop.f32.mrb[76].mxu1 }
 0x282   : > { %v1275_v63 = vadd.f32 %v4088_v62, %v4953_v33  ;;  %v1266_v2 = vpop.f32.mrb[77].mxu1  ;;  %v1494_v3 = vpack.c.bf16 %v1452_v59, %v1451_v57 }
 0x283   : > { %v1267_v4 = vadd.f32 %v4953_v33, %v1266_v2  ;;  %v4089_v5 = vpop.f32.mrb[78].mxu1  ;;  %v1493_v6 = vpack.c.bf16 %v1450_v61, %v1449_v60 }
 0x284   : > { %v1391_v7 = vmul.f32 0.01, %v1275_v63  ;;  %v1278_v9 = vadd.f32 %v4089_v5, %v4953_v33  ;;  %v1269_v10 = vpop.f32.mrb[79].mxu1 }
 0x285   : > { %v1389_v11 = vmul.f32 0.01, %v1267_v4  ;;  %v1270_v12 = vadd.f32 %v4953_v33, %v1269_v10  ;;  %4162 = vmatprep.mubr.bf16.mxu0 %v1493_v6 }
 0x286   : > { %v1392_v13 = vmul.f32 0.01, %v1278_v9  ;;  %4163 = vmatmul.mubr.bf16.gmra.mrb[72].mxu0 %v1494_v3  ;;  %v1455_v15 = vmax.f32 %v1275_v63, %v1391_v7 }
 0x287   : > { %v1390_v14 = vmul.f32 0.01, %v1270_v12  ;;  %v1453_v18 = vmax.f32 %v1267_v4, %v1389_v11 }
 0x288   : > { %v1456_v16 = vmax.f32 %v1278_v9, %v1392_v13 }
 0x289   : > { %v1454_v19 = vmax.f32 %v1270_v12, %v1390_v14  ;;  %v4092_v20 = vpop.f32.mrb[80].mxu1 }
 0x28a   : > { %v1291_v21 = vadd.f32 %v4092_v20, %v4953_v33  ;;  %v1282_v22 = vpop.f32.mrb[81].mxu1  ;;  %v1496_v24 = vpack.c.bf16 %v1456_v16, %v1455_v15 }
 0x28b   : > { %v1283_v25 = vadd.f32 %v4953_v33, %v1282_v22  ;;  %v4093_v27 = vpop.f32.mrb[82].mxu1  ;;  %v1495_v28 = vpack.c.bf16 %v1454_v19, %v1453_v18 }
 0x28c   : > { %v1395_v29 = vmul.f32 0.01, %v1291_v21  ;;  %v1294_v30 = vadd.f32 %v4093_v27, %v4953_v33  ;;  %v1285_v31 = vpop.f32.mrb[83].mxu1 }
 0x28d   : > { %v1393_v32 = vmul.f32 0.01, %v1283_v25  ;;  %v1286_v34 = vadd.f32 %v4953_v33, %v1285_v31  ;;  %4166 = vmatprep.mubr.bf16.mxu0 %v1495_v28 }
 0x28e   : > { %v1396_v35 = vmul.f32 0.01, %v1294_v30  ;;  %4167 = vmatmul.mubr.bf16.gmra.mrb[76].mxu0 %v1496_v24  ;;  %v1459_v38 = vmax.f32 %v1291_v21, %v1395_v29 }
 0x28f   : > { %v1394_v37 = vmul.f32 0.01, %v1286_v34  ;;  %v1457_v40 = vmax.f32 %v1283_v25, %v1393_v32 }
 0x290   : > { %v1460_v39 = vmax.f32 %v1294_v30, %v1396_v35  ;;  %v5022_v35 = vld [vmem:[%s5315_s2 + $0x2] ss:$0 sm:$0xff] }
 0x291   : > { %v1458_v42 = vmax.f32 %v1286_v34, %v1394_v37  ;;  %v4096_v44 = vpop.f32.mrb[84].mxu1  ;;  %v4487_v34 = vld [vmem:[#allocation5 + $0x100] sm:$0xff]   ;;  %v4488_v37 = vld [vmem:[#allocation5 + $0x108] sm:$0xff]  }
 0x292   : > { %v1307_v45 = vadd.f32 %v4096_v44, %v4953_v33  ;;  %v1298_v46 = vpop.f32.mrb[85].mxu1  ;;  %v1498_v47 = vpack.c.bf16 %v1460_v39, %v1459_v38  ;;  %4266 = vmatprep.subr.bf16.mxu0 %v4487_v34 }
 0x293   : > { %v1299_v50 = vadd.f32 %v4953_v33, %v1298_v46  ;;  %v4097_v51 = vpop.f32.mrb[86].mxu1  ;;  %v1497_v52 = vpack.c.bf16 %v1458_v42, %v1457_v40  ;;  %4267 = vmatpush3.bf16.msra.mxu0 %v4487_v34 }
 0x294   : > { %v1399_v53 = vmul.f32 0.01, %v1307_v45  ;;  %v1310_v54 = vadd.f32 %v4097_v51, %v4953_v33  ;;  %v1301_v55 = vpop.f32.mrb[87].mxu1  ;;  %4268 = vmatprep.subr.bf16.mxu0 %v4488_v37 }
 0x295   : > { %v1397_v56 = vmul.f32 0.01, %v1299_v50  ;;  %v1302_v48 = vadd.f32 %v4953_v33, %v1301_v55  ;;  %4170 = vmatprep.mubr.bf16.mxu0 %v1497_v52  ;;  %v4489_v52 = vld [vmem:[#allocation5 + $0x110] sm:$0xff]  }
 0x296   : > { %v1400_v26 = vmul.f32 0.01, %v1310_v54  ;;  %4171 = vmatmul.mubr.bf16.gmra.mrb[80].mxu0 %v1498_v47  ;;  %v1463_v8 = vmax.f32 %v1307_v45, %v1399_v53  ;;  %v4490_v53 = vld [vmem:[#allocation5 + $0x118] sm:$0xff]  }
 0x297   : > { %v1398_v1 = vmul.f32 0.01, %v1302_v48  ;;  %v1461_v49 = vmax.f32 %v1299_v50, %v1397_v56  ;;  %4269 = vmatpush3.bf16.msra.mxu0 %v4488_v37 }
 0x298   : > { %v1464_v41 = vmax.f32 %v1310_v54, %v1400_v26  ;;  %4270 = vmatprep.subr.bf16.mxu0 %v4489_v52 }
 0x299   : > { %v1462_v17 = vmax.f32 %v1302_v48, %v1398_v1  ;;  %v4100_v23 = vpop.f32.mrb[88].mxu1 }
 0x29a   : > { %v1323_v58 = vadd.f32 %v4100_v23, %v4953_v33  ;;  %v1314_v0 = vpop.f32.mrb[89].mxu1  ;;  %v1500_v36 = vpack.c.bf16 %v1464_v41, %v1463_v8 }
 0x29b   : > { %v1315_v43 = vadd.f32 %v4953_v33, %v1314_v0  ;;  %v4101_v57 = vpop.f32.mrb[90].mxu1  ;;  %v1499_v59 = vpack.c.bf16 %v1462_v17, %v1461_v49  ;;  %4271 = vmatpush3.bf16.msra.mxu0 %v4489_v52  ;;  %v4491_v17 = vld [vmem:[#allocation5 + $0x120] sm:$0xff]  }
 0x29c   : > { %v1403_v60 = vmul.f32 0.01, %v1323_v58  ;;  %v1326_v61 = vadd.f32 %v4101_v57, %v4953_v33  ;;  %v1317_v62 = vpop.f32.mrb[91].mxu1  ;;  %4272 = vmatprep.subr.bf16.mxu0 %v4490_v53 }
 0x29d   : > { %v1401_v63 = vmul.f32 0.01, %v1315_v43  ;;  %v1318_v2 = vadd.f32 %v4953_v33, %v1317_v62  ;;  %4174 = vmatprep.mubr.bf16.mxu0 %v1499_v59  ;;  %v4492_v62 = vld [vmem:[#allocation5 + $0x128] sm:$0xff]  }
 0x29e   : > { %v1404_v3 = vmul.f32 0.01, %v1326_v61  ;;  %4175 = vmatmul.mubr.bf16.gmra.mrb[84].mxu0 %v1500_v36  ;;  %v1467_v5 = vmax.f32 %v1323_v58, %v1403_v60 }
 0x29f   : > { %v1402_v4 = vmul.f32 0.01, %v1318_v2  ;;  %v1465_v7 = vmax.f32 %v1315_v43, %v1401_v63  ;;  %4273 = vmatpush3.bf16.msra.mxu0 %v4490_v53 }
 0x2a0   : > { %v1468_v6 = vmax.f32 %v1326_v61, %v1404_v3  ;;  %4274 = vmatprep.subr.bf16.mxu0 %v4491_v17 }
 0x2a1   : > { %v1466_v9 = vmax.f32 %v1318_v2, %v1402_v4  ;;  %v4104_v10 = vpop.f32.mrb[92].mxu1 }
 0x2a2   : > { %v1339_v11 = vadd.f32 %v4104_v10, %v4953_v33  ;;  %v1330_v12 = vpop.f32.mrb[93].mxu1  ;;  %v1502_v13 = vpack.c.bf16 %v1468_v6, %v1467_v5 }
 0x2a3   : > { %v1331_v14 = vadd.f32 %v4953_v33, %v1330_v12  ;;  %v4105_v15 = vpop.f32.mrb[94].mxu1  ;;  %v1501_v16 = vpack.c.bf16 %v1466_v9, %v1465_v7  ;;  %4275 = vmatpush3.bf16.msra.mxu0 %v4491_v17 }
 0x2a4   : > { %v1407_v18 = vmul.f32 0.01, %v1339_v11  ;;  %v1342_v19 = vadd.f32 %v4105_v15, %v4953_v33  ;;  %v1333_v20 = vpop.f32.mrb[95].mxu1  ;;  %4276 = vmatprep.subr.bf16.mxu0 %v4492_v62 }
 0x2a5   : > { %v1405_v21 = vmul.f32 0.01, %v1331_v14  ;;  %v1334_v22 = vadd.f32 %v4953_v33, %v1333_v20  ;;  %4178 = vmatprep.mubr.bf16.mxu0 %v1501_v16 }
 0x2a6   : > { %v1408_v24 = vmul.f32 0.01, %v1342_v19  ;;  %4179 = vmatmul.mubr.bf16.gmra.mrb[88].mxu0 %v1502_v13  ;;  %v1471_v27 = vmax.f32 %v1339_v11, %v1407_v18  ;;  %v4493_v11 = vld [vmem:[#allocation5 + $0x130] sm:$0xff]  }
 0x2a7   : > { %v1406_v25 = vmul.f32 0.01, %v1334_v22  ;;  %v1469_v29 = vmax.f32 %v1331_v14, %v1405_v21  ;;  %4277 = vmatpush3.bf16.msra.mxu0 %v4492_v62 }
 0x2a8   : > { %v1472_v28 = vmax.f32 %v1342_v19, %v1408_v24  ;;  %4278 = vmatprep.subr.bf16.mxu0 %v4493_v11 }
 0x2a9   : > { %v1470_v30 = vmax.f32 %v1334_v22, %v1406_v25  ;;  %v4494_v22 = vld [vmem:[#allocation5 + $0x138] sm:$0xff]  }
 0x2aa   : > { %v1504_v31 = vpack.c.bf16 %v1472_v28, %v1471_v27 }
 0x2ab   : > { %v1503_v32 = vpack.c.bf16 %v1470_v30, %v1469_v29  ;;  %4279 = vmatpush3.bf16.msra.mxu0 %v4493_v11 }
 0x2ac   : > { %4280 = vmatprep.subr.bf16.mxu0 %v4494_v22 }
 0x2ad   : > { %4182 = vmatprep.mubr.bf16.mxu0 %v1503_v32 }
 0x2ae   : > { %4183 = vmatmul.mubr.bf16.gmra.mrb[92].mxu0 %v1504_v31 }
 0x2af   : > { %4281 = vmatpush3.bf16.msra.mxu0 %v4494_v22 }
 0x309   : > { %v4124_v33 = vpop.f32.mrb[32].mxu0 }
 0x30a   : > { %v1621_v38 = vadd.f32 %v4124_v33, %v5022_v35  ;;  %v1612_v39 = vpop.f32.mrb[33].mxu0 }
 0x30b   : > { %v1613_v40 = vadd.f32 %v5022_v35, %v1612_v39  ;;  %v4125_v42 = vpop.f32.mrb[34].mxu0 }
 0x30c   : > { %v1869_v44 = vmul.f32 0.01, %v1621_v38  ;;  %v1624_v45 = vadd.f32 %v4125_v42, %v5022_v35  ;;  %v1615_v46 = vpop.f32.mrb[35].mxu0 }
 0x30d   : > { %v1867_v47 = vmul.f32 0.01, %v1613_v40  ;;  %v1616_v50 = vadd.f32 %v5022_v35, %v1615_v46 }
 0x30e   : > { %v1870_v51 = vmul.f32 0.01, %v1624_v45  ;;  %v1933_v55 = vmax.f32 %v1621_v38, %v1869_v44 }
 0x30f   : > { %v1868_v54 = vmul.f32 0.01, %v1616_v50  ;;  %v1931_v48 = vmax.f32 %v1613_v40, %v1867_v47 }
 0x310   : > { %v1934_v56 = vmax.f32 %v1624_v45, %v1870_v51 }
 0x311   : > { %v1932_v26 = vmax.f32 %v1616_v50, %v1868_v54  ;;  %v4128_v1 = vpop.f32.mrb[36].mxu0 }
 0x312   : > { %v1996_v8 = vpack.c.bf16 %v1934_v56, %v1933_v55  ;;  %v1637_v41 = vadd.f32 %v4128_v1, %v5022_v35  ;;  %v1628_v49 = vpop.f32.mrb[37].mxu0 }
 0x313   : > { %v1629_v23 = vadd.f32 %v5022_v35, %v1628_v49  ;;  %v4129_v58 = vpop.f32.mrb[38].mxu0  ;;  %v1995_v0 = vpack.c.bf16 %v1932_v26, %v1931_v48 }
 0x314   : > { %v1873_v36 = vmul.f32 0.01, %v1637_v41  ;;  %v1640_v43 = vadd.f32 %v4129_v58, %v5022_v35  ;;  %v1631_v57 = vpop.f32.mrb[39].mxu0 }
 0x315   : > { %v1871_v59 = vmul.f32 0.01, %v1629_v23  ;;  %v1632_v60 = vadd.f32 %v5022_v35, %v1631_v57  ;;  %4202 = vmatprep.mubr.bf16.mxu1 %v1995_v0 }
 0x316   : > { %v1874_v61 = vmul.f32 0.01, %v1640_v43  ;;  %4203 = vmatmul.mubr.bf16.vlgmr.msra.gmra.mrb[96].mxu1 %v1996_v8  ;;  %v1937_v2 = vmax.f32 %v1637_v41, %v1873_v36 }
 0x317   : > { %v1872_v63 = vmul.f32 0.01, %v1632_v60  ;;  %v1935_v4 = vmax.f32 %v1629_v23, %v1871_v59 }
 0x318   : > { %v1938_v3 = vmax.f32 %v1640_v43, %v1874_v61 }
 0x319   : > { %v1936_v5 = vmax.f32 %v1632_v60, %v1872_v63  ;;  %v4132_v6 = vpop.f32.mrb[40].mxu0 }
 0x31a   : > { %v1653_v7 = vadd.f32 %v4132_v6, %v5022_v35  ;;  %v1644_v9 = vpop.f32.mrb[41].mxu0  ;;  %v1998_v10 = vpack.c.bf16 %v1938_v3, %v1937_v2 }
 0x31b   : > { %v1645_v12 = vadd.f32 %v5022_v35, %v1644_v9  ;;  %v4133_v13 = vpop.f32.mrb[42].mxu0  ;;  %v1997_v14 = vpack.c.bf16 %v1936_v5, %v1935_v4 }
 0x31c   : > { %v1877_v15 = vmul.f32 0.01, %v1653_v7  ;;  %v1656_v16 = vadd.f32 %v4133_v13, %v5022_v35  ;;  %v1647_v18 = vpop.f32.mrb[43].mxu0 }
 0x31d   : > { %v1875_v19 = vmul.f32 0.01, %v1645_v12  ;;  %v1648_v20 = vadd.f32 %v5022_v35, %v1647_v18  ;;  %4206 = vmatprep.mubr.bf16.mxu1 %v1997_v14 }
 0x31e   : > { %v1878_v21 = vmul.f32 0.01, %v1656_v16  ;;  %4207 = vmatmul.mubr.bf16.gmra.mrb[100].mxu1 %v1998_v10  ;;  %v1941_v25 = vmax.f32 %v1653_v7, %v1877_v15 }
 0x31f   : > { %v1876_v24 = vmul.f32 0.01, %v1648_v20  ;;  %v1939_v28 = vmax.f32 %v1645_v12, %v1875_v19 }
 0x320   : > { %v1942_v27 = vmax.f32 %v1656_v16, %v1878_v21 }
 0x321   : > { %v1940_v29 = vmax.f32 %v1648_v20, %v1876_v24  ;;  %v4136_v30 = vpop.f32.mrb[44].mxu0 }
 0x322   : > { %v1669_v31 = vadd.f32 %v4136_v30, %v5022_v35  ;;  %v1660_v32 = vpop.f32.mrb[45].mxu0  ;;  %v2000_v34 = vpack.c.bf16 %v1942_v27, %v1941_v25 }
 0x323   : > { %v1661_v33 = vadd.f32 %v5022_v35, %v1660_v32  ;;  %v4137_v37 = vpop.f32.mrb[46].mxu0  ;;  %v1999_v38 = vpack.c.bf16 %v1940_v29, %v1939_v28 }
 0x324   : > { %v1881_v39 = vmul.f32 0.01, %v1669_v31  ;;  %v1672_v40 = vadd.f32 %v4137_v37, %v5022_v35  ;;  %v1663_v42 = vpop.f32.mrb[47].mxu0 }
 0x325   : > { %v1879_v44 = vmul.f32 0.01, %v1661_v33  ;;  %v1664_v45 = vadd.f32 %v5022_v35, %v1663_v42  ;;  %4210 = vmatprep.mubr.bf16.mxu1 %v1999_v38 }
 0x326   : > { %v1882_v46 = vmul.f32 0.01, %v1672_v40  ;;  %4211 = vmatmul.mubr.bf16.gmra.mrb[104].mxu1 %v2000_v34  ;;  %v1945_v50 = vmax.f32 %v1669_v31, %v1881_v39 }
 0x327   : > { %v1880_v47 = vmul.f32 0.01, %v1664_v45  ;;  %v1943_v52 = vmax.f32 %v1661_v33, %v1879_v44 }
 0x328   : > { %v1946_v51 = vmax.f32 %v1672_v40, %v1882_v46 }
 0x329   : > { %v1944_v53 = vmax.f32 %v1664_v45, %v1880_v47  ;;  %v4140_v54 = vpop.f32.mrb[48].mxu0 }
 0x32a   : > { %v1685_v55 = vadd.f32 %v4140_v54, %v5022_v35  ;;  %v1676_v56 = vpop.f32.mrb[49].mxu0  ;;  %v2002_v48 = vpack.c.bf16 %v1946_v51, %v1945_v50 }
 0x32b   : > { %v1677_v26 = vadd.f32 %v5022_v35, %v1676_v56  ;;  %v4141_v1 = vpop.f32.mrb[50].mxu0  ;;  %v2001_v8 = vpack.c.bf16 %v1944_v53, %v1943_v52 }
 0x32c   : > { %v1885_v41 = vmul.f32 0.01, %v1685_v55  ;;  %v1688_v49 = vadd.f32 %v4141_v1, %v5022_v35  ;;  %v1679_v17 = vpop.f32.mrb[51].mxu0 }
 0x32d   : > { %v1883_v23 = vmul.f32 0.01, %v1677_v26  ;;  %v1680_v58 = vadd.f32 %v5022_v35, %v1679_v17  ;;  %4214 = vmatprep.mubr.bf16.mxu1 %v2001_v8 }
 0x32e   : > { %v1886_v0 = vmul.f32 0.01, %v1688_v49  ;;  %4215 = vmatmul.mubr.bf16.gmra.mrb[108].mxu1 %v2002_v48  ;;  %v1949_v43 = vmax.f32 %v1685_v55, %v1885_v41 }
 0x32f   : > { %v1884_v36 = vmul.f32 0.01, %v1680_v58  ;;  %v1947_v59 = vmax.f32 %v1677_v26, %v1883_v23 }
 0x330   : > { %v1950_v57 = vmax.f32 %v1688_v49, %v1886_v0 }
 0x331   : > { %v1948_v60 = vmax.f32 %v1680_v58, %v1884_v36  ;;  %v4144_v61 = vpop.f32.mrb[52].mxu0 }
 0x332   : > { %v1701_v62 = vadd.f32 %v4144_v61, %v5022_v35  ;;  %v1692_v63 = vpop.f32.mrb[53].mxu0  ;;  %v2004_v2 = vpack.c.bf16 %v1950_v57, %v1949_v43 }
 0x333   : > { %v1693_v3 = vadd.f32 %v5022_v35, %v1692_v63  ;;  %v4145_v4 = vpop.f32.mrb[54].mxu0  ;;  %v2003_v5 = vpack.c.bf16 %v1948_v60, %v1947_v59 }
 0x334   : > { %v1889_v6 = vmul.f32 0.01, %v1701_v62  ;;  %v1704_v7 = vadd.f32 %v4145_v4, %v5022_v35  ;;  %v1695_v9 = vpop.f32.mrb[55].mxu0 }
 0x335   : > { %v1887_v10 = vmul.f32 0.01, %v1693_v3  ;;  %v1696_v11 = vadd.f32 %v5022_v35, %v1695_v9  ;;  %4218 = vmatprep.mubr.bf16.mxu1 %v2003_v5 }
 0x336   : > { %v1890_v12 = vmul.f32 0.01, %v1704_v7  ;;  %4219 = vmatmul.mubr.bf16.gmra.mrb[112].mxu1 %v2004_v2  ;;  %v1953_v14 = vmax.f32 %v1701_v62, %v1889_v6 }
 0x337   : > { %v1888_v13 = vmul.f32 0.01, %v1696_v11  ;;  %v1951_v16 = vmax.f32 %v1693_v3, %v1887_v10 }
 0x338   : > { %v1954_v15 = vmax.f32 %v1704_v7, %v1890_v12 }
 0x339   : > { %v1952_v18 = vmax.f32 %v1696_v11, %v1888_v13  ;;  %v4148_v19 = vpop.f32.mrb[56].mxu0 }
 0x33a   : > { %v1717_v20 = vadd.f32 %v4148_v19, %v5022_v35  ;;  %v1708_v21 = vpop.f32.mrb[57].mxu0  ;;  %v2006_v22 = vpack.c.bf16 %v1954_v15, %v1953_v14 }
 0x33b   : > { %v1709_v24 = vadd.f32 %v5022_v35, %v1708_v21  ;;  %v4149_v25 = vpop.f32.mrb[58].mxu0  ;;  %v2005_v27 = vpack.c.bf16 %v1952_v18, %v1951_v16 }
 0x33c   : > { %v1893_v28 = vmul.f32 0.01, %v1717_v20  ;;  %v1720_v29 = vadd.f32 %v4149_v25, %v5022_v35  ;;  %v1711_v30 = vpop.f32.mrb[59].mxu0 }
 0x33d   : > { %v1891_v31 = vmul.f32 0.01, %v1709_v24  ;;  %v1712_v32 = vadd.f32 %v5022_v35, %v1711_v30  ;;  %4222 = vmatprep.mubr.bf16.mxu1 %v2005_v27 }
 0x33e   : > { %v1894_v34 = vmul.f32 0.01, %v1720_v29  ;;  %4223 = vmatmul.mubr.bf16.gmra.mrb[116].mxu1 %v2006_v22  ;;  %v1957_v37 = vmax.f32 %v1717_v20, %v1893_v28 }
 0x33f   : > { %v1892_v33 = vmul.f32 0.01, %v1712_v32  ;;  %v1955_v39 = vmax.f32 %v1709_v24, %v1891_v31 }
 0x340   : > { %v1958_v38 = vmax.f32 %v1720_v29, %v1894_v34 }
 0x341   : > { %v1956_v40 = vmax.f32 %v1712_v32, %v1892_v33  ;;  %v4152_v42 = vpop.f32.mrb[60].mxu0 }
 0x342   : > { %v1733_v44 = vadd.f32 %v4152_v42, %v5022_v35  ;;  %v1724_v45 = vpop.f32.mrb[61].mxu0  ;;  %v2008_v46 = vpack.c.bf16 %v1958_v38, %v1957_v37 }
 0x343   : > { %v1725_v47 = vadd.f32 %v5022_v35, %v1724_v45  ;;  %v4153_v50 = vpop.f32.mrb[62].mxu0  ;;  %v2007_v51 = vpack.c.bf16 %v1956_v40, %v1955_v39 }
 0x344   : > { %v1897_v52 = vmul.f32 0.01, %v1733_v44  ;;  %v1736_v53 = vadd.f32 %v4153_v50, %v5022_v35  ;;  %v1727_v54 = vpop.f32.mrb[63].mxu0 }
 0x345   : > { %v1895_v55 = vmul.f32 0.01, %v1725_v47  ;;  %v1728_v56 = vadd.f32 %v5022_v35, %v1727_v54  ;;  %4226 = vmatprep.mubr.bf16.mxu1 %v2007_v51 }
 0x346   : > { %v1898_v48 = vmul.f32 0.01, %v1736_v53  ;;  %4227 = vmatmul.mubr.bf16.gmra.mrb[120].mxu1 %v2008_v46  ;;  %v1961_v1 = vmax.f32 %v1733_v44, %v1897_v52 }
 0x347   : > { %v1896_v26 = vmul.f32 0.01, %v1728_v56  ;;  %v1959_v41 = vmax.f32 %v1725_v47, %v1895_v55 }
 0x348   : > { %v1962_v8 = vmax.f32 %v1736_v53, %v1898_v48 }
 0x349   : > { %v1960_v49 = vmax.f32 %v1728_v56, %v1896_v26  ;;  %v4156_v17 = vpop.f32.mrb[64].mxu0 }
 0x34a   : > { %v1749_v23 = vadd.f32 %v4156_v17, %v5022_v35  ;;  %v1740_v58 = vpop.f32.mrb[65].mxu0  ;;  %v2010_v0 = vpack.c.bf16 %v1962_v8, %v1961_v1 }
 0x34b   : > { %v1741_v36 = vadd.f32 %v5022_v35, %v1740_v58  ;;  %v4157_v43 = vpop.f32.mrb[66].mxu0  ;;  %v2009_v57 = vpack.c.bf16 %v1960_v49, %v1959_v41 }
 0x34c   : > { %v1901_v59 = vmul.f32 0.01, %v1749_v23  ;;  %v1752_v60 = vadd.f32 %v4157_v43, %v5022_v35  ;;  %v1743_v61 = vpop.f32.mrb[67].mxu0 }
 0x34d   : > { %v1899_v62 = vmul.f32 0.01, %v1741_v36  ;;  %v1744_v63 = vadd.f32 %v5022_v35, %v1743_v61  ;;  %4230 = vmatprep.mubr.bf16.mxu1 %v2009_v57 }
 0x34e   : > { %v1902_v2 = vmul.f32 0.01, %v1752_v60  ;;  %4231 = vmatmul.mubr.bf16.gmra.mrb[124].mxu1 %v2010_v0  ;;  %v1965_v4 = vmax.f32 %v1749_v23, %v1901_v59 }
 0x34f   : > { %v1900_v3 = vmul.f32 0.01, %v1744_v63  ;;  %v1963_v6 = vmax.f32 %v1741_v36, %v1899_v62 }
 0x350   : > { %v1966_v5 = vmax.f32 %v1752_v60, %v1902_v2 }
 0x351   : > { %v1964_v7 = vmax.f32 %v1744_v63, %v1900_v3  ;;  %v4160_v9 = vpop.f32.mrb[68].mxu0 }
 0x352   : > { %v1765_v10 = vadd.f32 %v4160_v9, %v5022_v35  ;;  %v1756_v11 = vpop.f32.mrb[69].mxu0  ;;  %v2012_v12 = vpack.c.bf16 %v1966_v5, %v1965_v4 }
 0x353   : > { %v1757_v13 = vadd.f32 %v5022_v35, %v1756_v11  ;;  %v4161_v14 = vpop.f32.mrb[70].mxu0  ;;  %v2011_v15 = vpack.c.bf16 %v1964_v7, %v1963_v6 }
 0x354   : > { %v1905_v16 = vmul.f32 0.01, %v1765_v10  ;;  %v1768_v18 = vadd.f32 %v4161_v14, %v5022_v35  ;;  %v1759_v19 = vpop.f32.mrb[71].mxu0 }
 0x355   : > { %v1903_v20 = vmul.f32 0.01, %v1757_v13  ;;  %v1760_v21 = vadd.f32 %v5022_v35, %v1759_v19  ;;  %4234 = vmatprep.mubr.bf16.mxu1 %v2011_v15 }
 0x356   : > { %v1906_v22 = vmul.f32 0.01, %v1768_v18  ;;  %4235 = vmatmul.mubr.bf16.gmra.mrb[128].mxu1 %v2012_v12  ;;  %v1969_v25 = vmax.f32 %v1765_v10, %v1905_v16 }
 0x357   : > { %v1904_v24 = vmul.f32 0.01, %v1760_v21  ;;  %v1967_v28 = vmax.f32 %v1757_v13, %v1903_v20 }
 0x358   : > { %v1970_v27 = vmax.f32 %v1768_v18, %v1906_v22 }
 0x359   : > { %v1968_v29 = vmax.f32 %v1760_v21, %v1904_v24  ;;  %v4164_v30 = vpop.f32.mrb[72].mxu0 }
 0x35a   : > { %v1781_v31 = vadd.f32 %v4164_v30, %v5022_v35  ;;  %v1772_v32 = vpop.f32.mrb[73].mxu0  ;;  %v2014_v34 = vpack.c.bf16 %v1970_v27, %v1969_v25 }
 0x35b   : > { %v1773_v33 = vadd.f32 %v5022_v35, %v1772_v32  ;;  %v4165_v37 = vpop.f32.mrb[74].mxu0  ;;  %v2013_v38 = vpack.c.bf16 %v1968_v29, %v1967_v28 }
 0x35c   : > { %v1909_v39 = vmul.f32 0.01, %v1781_v31  ;;  %v1784_v40 = vadd.f32 %v4165_v37, %v5022_v35  ;;  %v1775_v42 = vpop.f32.mrb[75].mxu0 }
 0x35d   : > { %v1907_v44 = vmul.f32 0.01, %v1773_v33  ;;  %v1776_v45 = vadd.f32 %v5022_v35, %v1775_v42  ;;  %4238 = vmatprep.mubr.bf16.mxu1 %v2013_v38 }
 0x35e   : > { %v1910_v46 = vmul.f32 0.01, %v1784_v40  ;;  %4239 = vmatmul.mubr.bf16.gmra.mrb[132].mxu1 %v2014_v34  ;;  %v1973_v50 = vmax.f32 %v1781_v31, %v1909_v39 }
 0x35f   : > { %v1908_v47 = vmul.f32 0.01, %v1776_v45  ;;  %v1971_v52 = vmax.f32 %v1773_v33, %v1907_v44 }
 0x360   : > { %v1974_v51 = vmax.f32 %v1784_v40, %v1910_v46 }
 0x361   : > { %v1972_v53 = vmax.f32 %v1776_v45, %v1908_v47  ;;  %v4168_v54 = vpop.f32.mrb[76].mxu0 }
 0x362   : > { %v1797_v55 = vadd.f32 %v4168_v54, %v5022_v35  ;;  %v1788_v56 = vpop.f32.mrb[77].mxu0  ;;  %v2016_v48 = vpack.c.bf16 %v1974_v51, %v1973_v50 }
 0x363   : > { %v1789_v26 = vadd.f32 %v5022_v35, %v1788_v56  ;;  %v4169_v1 = vpop.f32.mrb[78].mxu0  ;;  %v2015_v8 = vpack.c.bf16 %v1972_v53, %v1971_v52 }
 0x364   : > { %v1913_v41 = vmul.f32 0.01, %v1797_v55  ;;  %v1800_v49 = vadd.f32 %v4169_v1, %v5022_v35  ;;  %v1791_v17 = vpop.f32.mrb[79].mxu0 }
 0x365   : > { %v1911_v23 = vmul.f32 0.01, %v1789_v26  ;;  %v1792_v58 = vadd.f32 %v5022_v35, %v1791_v17  ;;  %4242 = vmatprep.mubr.bf16.mxu1 %v2015_v8 }
 0x366   : > { %v1914_v0 = vmul.f32 0.01, %v1800_v49  ;;  %4243 = vmatmul.mubr.bf16.gmra.mrb[136].mxu1 %v2016_v48  ;;  %v1977_v43 = vmax.f32 %v1797_v55, %v1913_v41 }
 0x367   : > { %v1912_v36 = vmul.f32 0.01, %v1792_v58  ;;  %v1975_v59 = vmax.f32 %v1789_v26, %v1911_v23 }
 0x368   : > { %v1978_v57 = vmax.f32 %v1800_v49, %v1914_v0 }
 0x369   : > { %v1976_v60 = vmax.f32 %v1792_v58, %v1912_v36  ;;  %v4172_v61 = vpop.f32.mrb[80].mxu0 }
 0x36a   : > { %v1813_v62 = vadd.f32 %v4172_v61, %v5022_v35  ;;  %v1804_v63 = vpop.f32.mrb[81].mxu0  ;;  %v2018_v2 = vpack.c.bf16 %v1978_v57, %v1977_v43 }
 0x36b   : > { %v1805_v3 = vadd.f32 %v5022_v35, %v1804_v63  ;;  %v4173_v4 = vpop.f32.mrb[82].mxu0  ;;  %v2017_v5 = vpack.c.bf16 %v1976_v60, %v1975_v59 }
 0x36c   : > { %v1917_v6 = vmul.f32 0.01, %v1813_v62  ;;  %v1816_v7 = vadd.f32 %v4173_v4, %v5022_v35  ;;  %v1807_v9 = vpop.f32.mrb[83].mxu0 }
 0x36d   : > { %v1915_v10 = vmul.f32 0.01, %v1805_v3  ;;  %v1808_v11 = vadd.f32 %v5022_v35, %v1807_v9  ;;  %4246 = vmatprep.mubr.bf16.mxu1 %v2017_v5 }
 0x36e   : > { %v1918_v12 = vmul.f32 0.01, %v1816_v7  ;;  %4247 = vmatmul.mubr.bf16.gmra.mrb[140].mxu1 %v2018_v2  ;;  %v1981_v14 = vmax.f32 %v1813_v62, %v1917_v6 }
 0x36f   : > { %v1916_v13 = vmul.f32 0.01, %v1808_v11  ;;  %v1979_v16 = vmax.f32 %v1805_v3, %v1915_v10 }
 0x370   : > { %v1982_v15 = vmax.f32 %v1816_v7, %v1918_v12 }
 0x371   : > { %v1980_v18 = vmax.f32 %v1808_v11, %v1916_v13  ;;  %v4176_v19 = vpop.f32.mrb[84].mxu0  ;;  %v5091_v11 = vld [vmem:[%s5315_s2 + $0x3] ss:$0 sm:$0xff] }
 0x372   : > { %v1829_v20 = vadd.f32 %v4176_v19, %v5022_v35  ;;  %v1820_v21 = vpop.f32.mrb[85].mxu0  ;;  %v2020_v22 = vpack.c.bf16 %v1982_v15, %v1981_v14 }
 0x373   : > { %v1821_v24 = vadd.f32 %v5022_v35, %v1820_v21  ;;  %v4177_v25 = vpop.f32.mrb[86].mxu0  ;;  %v2019_v27 = vpack.c.bf16 %v1980_v18, %v1979_v16 }
 0x374   : > { %v1921_v28 = vmul.f32 0.01, %v1829_v20  ;;  %v1832_v29 = vadd.f32 %v4177_v25, %v5022_v35  ;;  %v1823_v30 = vpop.f32.mrb[87].mxu0 }
 0x375   : > { %v1919_v31 = vmul.f32 0.01, %v1821_v24  ;;  %v1824_v32 = vadd.f32 %v5022_v35, %v1823_v30  ;;  %4250 = vmatprep.mubr.bf16.mxu1 %v2019_v27 }
 0x376   : > { %v1922_v34 = vmul.f32 0.01, %v1832_v29  ;;  %4251 = vmatmul.mubr.bf16.gmra.mrb[144].mxu1 %v2020_v22  ;;  %v1985_v37 = vmax.f32 %v1829_v20, %v1921_v28 }
 0x377   : > { %v1920_v33 = vmul.f32 0.01, %v1824_v32  ;;  %v1983_v39 = vmax.f32 %v1821_v24, %v1919_v31 }
 0x378   : > { %v1986_v38 = vmax.f32 %v1832_v29, %v1922_v34 }
 0x379   : > { %v1984_v40 = vmax.f32 %v1824_v32, %v1920_v33  ;;  %v4180_v42 = vpop.f32.mrb[88].mxu0 }
 0x37a   : > { %v1845_v44 = vadd.f32 %v4180_v42, %v5022_v35  ;;  %v1836_v45 = vpop.f32.mrb[89].mxu0  ;;  %v2022_v46 = vpack.c.bf16 %v1986_v38, %v1985_v37 }
 0x37b   : > { %v1837_v47 = vadd.f32 %v5022_v35, %v1836_v45  ;;  %v4181_v50 = vpop.f32.mrb[90].mxu0  ;;  %v2021_v51 = vpack.c.bf16 %v1984_v40, %v1983_v39 }
 0x37c   : > { %v1925_v52 = vmul.f32 0.01, %v1845_v44  ;;  %v1848_v53 = vadd.f32 %v4181_v50, %v5022_v35  ;;  %v1839_v54 = vpop.f32.mrb[91].mxu0 }
 0x37d   : > { %v1923_v55 = vmul.f32 0.01, %v1837_v47  ;;  %v1840_v56 = vadd.f32 %v5022_v35, %v1839_v54  ;;  %4254 = vmatprep.mubr.bf16.mxu1 %v2021_v51 }
 0x37e   : > { %v1926_v48 = vmul.f32 0.01, %v1848_v53  ;;  %4255 = vmatmul.mubr.bf16.gmra.mrb[148].mxu1 %v2022_v46  ;;  %v1989_v1 = vmax.f32 %v1845_v44, %v1925_v52 }
 0x37f   : > { %v1924_v26 = vmul.f32 0.01, %v1840_v56  ;;  %v1987_v41 = vmax.f32 %v1837_v47, %v1923_v55 }
 0x380   : > { %v1990_v8 = vmax.f32 %v1848_v53, %v1926_v48 }
 0x381   : > { %v1988_v49 = vmax.f32 %v1840_v56, %v1924_v26  ;;  %v4184_v17 = vpop.f32.mrb[92].mxu0 }
 0x382   : > { %v1861_v23 = vadd.f32 %v4184_v17, %v5022_v35  ;;  %v1852_v58 = vpop.f32.mrb[93].mxu0  ;;  %v2024_v0 = vpack.c.bf16 %v1990_v8, %v1989_v1 }
 0x383   : > { %v1853_v36 = vadd.f32 %v5022_v35, %v1852_v58  ;;  %v4185_v43 = vpop.f32.mrb[94].mxu0  ;;  %v2023_v57 = vpack.c.bf16 %v1988_v49, %v1987_v41 }
 0x384   : > { %v1929_v59 = vmul.f32 0.01, %v1861_v23  ;;  %v1864_v60 = vadd.f32 %v4185_v43, %v5022_v35  ;;  %v1855_v61 = vpop.f32.mrb[95].mxu0 }
 0x385   : > { %v1927_v62 = vmul.f32 0.01, %v1853_v36  ;;  %v1856_v63 = vadd.f32 %v5022_v35, %v1855_v61  ;;  %4258 = vmatprep.mubr.bf16.mxu1 %v2023_v57 }
 0x386   : > { %v1930_v2 = vmul.f32 0.01, %v1864_v60  ;;  %4259 = vmatmul.mubr.bf16.gmra.mrb[152].mxu1 %v2024_v0  ;;  %v1993_v4 = vmax.f32 %v1861_v23, %v1929_v59 }
 0x387   : > { %v1928_v3 = vmul.f32 0.01, %v1856_v63  ;;  %v1991_v6 = vmax.f32 %v1853_v36, %v1927_v62 }
 0x388   : > { %v1994_v5 = vmax.f32 %v1864_v60, %v1930_v2 }
 0x389   : > { %v1992_v7 = vmax.f32 %v1856_v63, %v1928_v3 }
 0x38a   : > { %v2026_v9 = vpack.c.bf16 %v1994_v5, %v1993_v4 }
 0x38b   : > { %v2025_v10 = vpack.c.bf16 %v1992_v7, %v1991_v6 }
 0x38d   : > { %4262 = vmatprep.mubr.bf16.mxu1 %v2025_v10 }
 0x38e   : > { %4263 = vmatmul.mubr.bf16.gmra.mrb[156].mxu1 %v2026_v9 }
 0x3e9   : > { %v4204_v12 = vpop.f32.mrb[96].mxu1 }
 0x3ea   : > { %v2143_v35 = vadd.f32 %v4204_v12, %v5091_v11  ;;  %v2134_v13 = vpop.f32.mrb[97].mxu1 }
 0x3eb   : > { %v2135_v14 = vadd.f32 %v5091_v11, %v2134_v13  ;;  %v4205_v15 = vpop.f32.mrb[98].mxu1 }
 0x3ec   : > { %v2391_v16 = vmul.f32 0.01, %v2143_v35  ;;  %v2146_v18 = vadd.f32 %v4205_v15, %v5091_v11  ;;  %v2137_v19 = vpop.f32.mrb[99].mxu1 }
 0x3ed   : > { %v2389_v20 = vmul.f32 0.01, %v2135_v14  ;;  %v2138_v21 = vadd.f32 %v5091_v11, %v2137_v19 }
 0x3ee   : > { %v2392_v22 = vmul.f32 0.01, %v2146_v18  ;;  %v2455_v25 = vmax.f32 %v2143_v35, %v2391_v16 }
 0x3ef   : > { %v2390_v24 = vmul.f32 0.01, %v2138_v21  ;;  %v2453_v28 = vmax.f32 %v2135_v14, %v2389_v20 }
 0x3f0   : > { %v2456_v27 = vmax.f32 %v2146_v18, %v2392_v22 }
 0x3f1   : > { %v2454_v29 = vmax.f32 %v2138_v21, %v2390_v24  ;;  %v4208_v30 = vpop.f32.mrb[100].mxu1 }
 0x3f2   : > { %v2518_v31 = vpack.c.bf16 %v2456_v27, %v2455_v25  ;;  %v2159_v32 = vadd.f32 %v4208_v30, %v5091_v11  ;;  %v2150_v34 = vpop.f32.mrb[101].mxu1 }
 0x3f3   : > { %v2151_v33 = vadd.f32 %v5091_v11, %v2150_v34  ;;  %v4209_v37 = vpop.f32.mrb[102].mxu1  ;;  %v2517_v38 = vpack.c.bf16 %v2454_v29, %v2453_v28 }
 0x3f4   : > { %v2395_v39 = vmul.f32 0.01, %v2159_v32  ;;  %v2162_v40 = vadd.f32 %v4209_v37, %v5091_v11  ;;  %v2153_v42 = vpop.f32.mrb[103].mxu1 }
 0x3f5   : > { %v2393_v44 = vmul.f32 0.01, %v2151_v33  ;;  %v2154_v45 = vadd.f32 %v5091_v11, %v2153_v42  ;;  %4282 = vmatprep.mubr.bf16.mxu0 %v2517_v38 }
 0x3f6   : > { %v2396_v46 = vmul.f32 0.01, %v2162_v40  ;;  %4283 = vmatmul.mubr.bf16.vlgmr.msra.gmra.mrb[96].mxu0 %v2518_v31  ;;  %v2459_v50 = vmax.f32 %v2159_v32, %v2395_v39 }
 0x3f7   : > { %v2394_v47 = vmul.f32 0.01, %v2154_v45  ;;  %v2457_v52 = vmax.f32 %v2151_v33, %v2393_v44 }
 0x3f8   : > { %v2460_v51 = vmax.f32 %v2162_v40, %v2396_v46 }
 0x3f9   : > { %v2458_v53 = vmax.f32 %v2154_v45, %v2394_v47  ;;  %v4212_v54 = vpop.f32.mrb[104].mxu1 }
 0x3fa   : > { %v2175_v55 = vadd.f32 %v4212_v54, %v5091_v11  ;;  %v2166_v56 = vpop.f32.mrb[105].mxu1  ;;  %v2520_v48 = vpack.c.bf16 %v2460_v51, %v2459_v50 }
 0x3fb   : > { %v2167_v26 = vadd.f32 %v5091_v11, %v2166_v56  ;;  %v4213_v1 = vpop.f32.mrb[106].mxu1  ;;  %v2519_v8 = vpack.c.bf16 %v2458_v53, %v2457_v52 }
 0x3fc   : > { %v2399_v41 = vmul.f32 0.01, %v2175_v55  ;;  %v2178_v49 = vadd.f32 %v4213_v1, %v5091_v11  ;;  %v2169_v17 = vpop.f32.mrb[107].mxu1 }
 0x3fd   : > { %v2397_v23 = vmul.f32 0.01, %v2167_v26  ;;  %v2170_v58 = vadd.f32 %v5091_v11, %v2169_v17  ;;  %4286 = vmatprep.mubr.bf16.mxu0 %v2519_v8 }
 0x3fe   : > { %v2400_v0 = vmul.f32 0.01, %v2178_v49  ;;  %4287 = vmatmul.mubr.bf16.gmra.mrb[100].mxu0 %v2520_v48  ;;  %v2463_v43 = vmax.f32 %v2175_v55, %v2399_v41 }
 0x3ff   : > { %v2398_v36 = vmul.f32 0.01, %v2170_v58  ;;  %v2461_v59 = vmax.f32 %v2167_v26, %v2397_v23 }
 0x400   : > { %v2464_v57 = vmax.f32 %v2178_v49, %v2400_v0 }
 0x401   : > { %v2462_v60 = vmax.f32 %v2170_v58, %v2398_v36  ;;  %v4216_v61 = vpop.f32.mrb[108].mxu1 }
 0x402   : > { %v2191_v62 = vadd.f32 %v4216_v61, %v5091_v11  ;;  %v2182_v63 = vpop.f32.mrb[109].mxu1  ;;  %v2522_v2 = vpack.c.bf16 %v2464_v57, %v2463_v43 }
 0x403   : > { %v2183_v3 = vadd.f32 %v5091_v11, %v2182_v63  ;;  %v4217_v4 = vpop.f32.mrb[110].mxu1  ;;  %v2521_v5 = vpack.c.bf16 %v2462_v60, %v2461_v59 }
 0x404   : > { %v2403_v6 = vmul.f32 0.01, %v2191_v62  ;;  %v2194_v7 = vadd.f32 %v4217_v4, %v5091_v11  ;;  %v2185_v9 = vpop.f32.mrb[111].mxu1 }
 0x405   : > { %v2401_v10 = vmul.f32 0.01, %v2183_v3  ;;  %v2186_v12 = vadd.f32 %v5091_v11, %v2185_v9  ;;  %4290 = vmatprep.mubr.bf16.mxu0 %v2521_v5 }
 0x406   : > { %v2404_v35 = vmul.f32 0.01, %v2194_v7  ;;  %4291 = vmatmul.mubr.bf16.gmra.mrb[104].mxu0 %v2522_v2  ;;  %v2467_v14 = vmax.f32 %v2191_v62, %v2403_v6 }
 0x407   : > { %v2402_v13 = vmul.f32 0.01, %v2186_v12  ;;  %v2465_v16 = vmax.f32 %v2183_v3, %v2401_v10 }
 0x408   : > { %v2468_v15 = vmax.f32 %v2194_v7, %v2404_v35 }
 0x409   : > { %v2466_v18 = vmax.f32 %v2186_v12, %v2402_v13  ;;  %v4220_v19 = vpop.f32.mrb[112].mxu1 }
 0x40a   : > { %v2207_v20 = vadd.f32 %v4220_v19, %v5091_v11  ;;  %v2198_v21 = vpop.f32.mrb[113].mxu1  ;;  %v2524_v22 = vpack.c.bf16 %v2468_v15, %v2467_v14 }
 0x40b   : > { %v2199_v24 = vadd.f32 %v5091_v11, %v2198_v21  ;;  %v4221_v25 = vpop.f32.mrb[114].mxu1  ;;  %v2523_v27 = vpack.c.bf16 %v2466_v18, %v2465_v16 }
 0x40c   : > { %v2407_v28 = vmul.f32 0.01, %v2207_v20  ;;  %v2210_v29 = vadd.f32 %v4221_v25, %v5091_v11  ;;  %v2201_v30 = vpop.f32.mrb[115].mxu1 }
 0x40d   : > { %v2405_v31 = vmul.f32 0.01, %v2199_v24  ;;  %v2202_v32 = vadd.f32 %v5091_v11, %v2201_v30  ;;  %4294 = vmatprep.mubr.bf16.mxu0 %v2523_v27 }
 0x40e   : > { %v2408_v34 = vmul.f32 0.01, %v2210_v29  ;;  %4295 = vmatmul.mubr.bf16.gmra.mrb[108].mxu0 %v2524_v22  ;;  %v2471_v37 = vmax.f32 %v2207_v20, %v2407_v28 }
 0x40f   : > { %v2406_v33 = vmul.f32 0.01, %v2202_v32  ;;  %v2469_v39 = vmax.f32 %v2199_v24, %v2405_v31 }
 0x410   : > { %v2472_v38 = vmax.f32 %v2210_v29, %v2408_v34 }
 0x411   : > { %v2470_v40 = vmax.f32 %v2202_v32, %v2406_v33  ;;  %v4224_v42 = vpop.f32.mrb[116].mxu1 }
 0x412   : > { %v2223_v44 = vadd.f32 %v4224_v42, %v5091_v11  ;;  %v2214_v45 = vpop.f32.mrb[117].mxu1  ;;  %v2526_v46 = vpack.c.bf16 %v2472_v38, %v2471_v37 }
 0x413   : > { %v2215_v47 = vadd.f32 %v5091_v11, %v2214_v45  ;;  %v4225_v50 = vpop.f32.mrb[118].mxu1  ;;  %v2525_v51 = vpack.c.bf16 %v2470_v40, %v2469_v39 }
 0x414   : > { %v2411_v52 = vmul.f32 0.01, %v2223_v44  ;;  %v2226_v53 = vadd.f32 %v4225_v50, %v5091_v11  ;;  %v2217_v54 = vpop.f32.mrb[119].mxu1 }
 0x415   : > { %v2409_v55 = vmul.f32 0.01, %v2215_v47  ;;  %v2218_v56 = vadd.f32 %v5091_v11, %v2217_v54  ;;  %4298 = vmatprep.mubr.bf16.mxu0 %v2525_v51 }
 0x416   : > { %v2412_v48 = vmul.f32 0.01, %v2226_v53  ;;  %4299 = vmatmul.mubr.bf16.gmra.mrb[112].mxu0 %v2526_v46  ;;  %v2475_v1 = vmax.f32 %v2223_v44, %v2411_v52 }
 0x417   : > { %v2410_v26 = vmul.f32 0.01, %v2218_v56  ;;  %v2473_v41 = vmax.f32 %v2215_v47, %v2409_v55 }
 0x418   : > { %v2476_v8 = vmax.f32 %v2226_v53, %v2412_v48 }
 0x419   : > { %v2474_v49 = vmax.f32 %v2218_v56, %v2410_v26  ;;  %v4228_v17 = vpop.f32.mrb[120].mxu1 }
 0x41a   : > { %v2239_v23 = vadd.f32 %v4228_v17, %v5091_v11  ;;  %v2230_v58 = vpop.f32.mrb[121].mxu1  ;;  %v2528_v0 = vpack.c.bf16 %v2476_v8, %v2475_v1 }
 0x41b   : > { %v2231_v36 = vadd.f32 %v5091_v11, %v2230_v58  ;;  %v4229_v43 = vpop.f32.mrb[122].mxu1  ;;  %v2527_v57 = vpack.c.bf16 %v2474_v49, %v2473_v41 }
 0x41c   : > { %v2415_v59 = vmul.f32 0.01, %v2239_v23  ;;  %v2242_v60 = vadd.f32 %v4229_v43, %v5091_v11  ;;  %v2233_v61 = vpop.f32.mrb[123].mxu1 }
 0x41d   : > { %v2413_v62 = vmul.f32 0.01, %v2231_v36  ;;  %v2234_v63 = vadd.f32 %v5091_v11, %v2233_v61  ;;  %4302 = vmatprep.mubr.bf16.mxu0 %v2527_v57 }
 0x41e   : > { %v2416_v2 = vmul.f32 0.01, %v2242_v60  ;;  %4303 = vmatmul.mubr.bf16.gmra.mrb[116].mxu0 %v2528_v0  ;;  %v2479_v4 = vmax.f32 %v2239_v23, %v2415_v59 }
 0x41f   : > { %v2414_v3 = vmul.f32 0.01, %v2234_v63  ;;  %v2477_v6 = vmax.f32 %v2231_v36, %v2413_v62 }
 0x420   : > { %v2480_v5 = vmax.f32 %v2242_v60, %v2416_v2 }
 0x421   : > { %v2478_v7 = vmax.f32 %v2234_v63, %v2414_v3  ;;  %v4232_v9 = vpop.f32.mrb[124].mxu1 }
 0x422   : > { %v2255_v10 = vadd.f32 %v4232_v9, %v5091_v11  ;;  %v2246_v12 = vpop.f32.mrb[125].mxu1  ;;  %v2530_v35 = vpack.c.bf16 %v2480_v5, %v2479_v4 }
 0x423   : > { %v2247_v13 = vadd.f32 %v5091_v11, %v2246_v12  ;;  %v4233_v14 = vpop.f32.mrb[126].mxu1  ;;  %v2529_v15 = vpack.c.bf16 %v2478_v7, %v2477_v6 }
 0x424   : > { %v2419_v16 = vmul.f32 0.01, %v2255_v10  ;;  %v2258_v18 = vadd.f32 %v4233_v14, %v5091_v11  ;;  %v2249_v19 = vpop.f32.mrb[127].mxu1 }
 0x425   : > { %v2417_v20 = vmul.f32 0.01, %v2247_v13  ;;  %v2250_v21 = vadd.f32 %v5091_v11, %v2249_v19  ;;  %4306 = vmatprep.mubr.bf16.mxu0 %v2529_v15 }
 0x426   : > { %v2420_v22 = vmul.f32 0.01, %v2258_v18  ;;  %4307 = vmatmul.mubr.bf16.gmra.mrb[120].mxu0 %v2530_v35  ;;  %v2483_v25 = vmax.f32 %v2255_v10, %v2419_v16 }
 0x427   : > { %v2418_v24 = vmul.f32 0.01, %v2250_v21  ;;  %v2481_v28 = vmax.f32 %v2247_v13, %v2417_v20 }
 0x428   : > { %v2484_v27 = vmax.f32 %v2258_v18, %v2420_v22 }
 0x429   : > { %v2482_v29 = vmax.f32 %v2250_v21, %v2418_v24  ;;  %v4236_v30 = vpop.f32.mrb[128].mxu1 }
 0x42a   : > { %v2271_v31 = vadd.f32 %v4236_v30, %v5091_v11  ;;  %v2262_v32 = vpop.f32.mrb[129].mxu1  ;;  %v2532_v34 = vpack.c.bf16 %v2484_v27, %v2483_v25 }
 0x42b   : > { %v2263_v33 = vadd.f32 %v5091_v11, %v2262_v32  ;;  %v4237_v37 = vpop.f32.mrb[130].mxu1  ;;  %v2531_v38 = vpack.c.bf16 %v2482_v29, %v2481_v28 }
 0x42c   : > { %v2423_v39 = vmul.f32 0.01, %v2271_v31  ;;  %v2274_v40 = vadd.f32 %v4237_v37, %v5091_v11  ;;  %v2265_v42 = vpop.f32.mrb[131].mxu1 }
 0x42d   : > { %v2421_v44 = vmul.f32 0.01, %v2263_v33  ;;  %v2266_v45 = vadd.f32 %v5091_v11, %v2265_v42  ;;  %4310 = vmatprep.mubr.bf16.mxu0 %v2531_v38 }
 0x42e   : > { %v2424_v46 = vmul.f32 0.01, %v2274_v40  ;;  %4311 = vmatmul.mubr.bf16.gmra.mrb[124].mxu0 %v2532_v34  ;;  %v2487_v50 = vmax.f32 %v2271_v31, %v2423_v39 }
 0x42f   : > { %v2422_v47 = vmul.f32 0.01, %v2266_v45  ;;  %v2485_v52 = vmax.f32 %v2263_v33, %v2421_v44 }
 0x430   : > { %v2488_v51 = vmax.f32 %v2274_v40, %v2424_v46 }
 0x431   : > { %v2486_v53 = vmax.f32 %v2266_v45, %v2422_v47  ;;  %v4240_v54 = vpop.f32.mrb[132].mxu1 }
 0x432   : > { %v2287_v55 = vadd.f32 %v4240_v54, %v5091_v11  ;;  %v2278_v56 = vpop.f32.mrb[133].mxu1  ;;  %v2534_v48 = vpack.c.bf16 %v2488_v51, %v2487_v50 }
 0x433   : > { %v2279_v26 = vadd.f32 %v5091_v11, %v2278_v56  ;;  %v4241_v1 = vpop.f32.mrb[134].mxu1  ;;  %v2533_v8 = vpack.c.bf16 %v2486_v53, %v2485_v52 }
 0x434   : > { %v2427_v41 = vmul.f32 0.01, %v2287_v55  ;;  %v2290_v49 = vadd.f32 %v4241_v1, %v5091_v11  ;;  %v2281_v17 = vpop.f32.mrb[135].mxu1 }
 0x435   : > { %v2425_v23 = vmul.f32 0.01, %v2279_v26  ;;  %v2282_v58 = vadd.f32 %v5091_v11, %v2281_v17  ;;  %4314 = vmatprep.mubr.bf16.mxu0 %v2533_v8 }
 0x436   : > { %v2428_v0 = vmul.f32 0.01, %v2290_v49  ;;  %4315 = vmatmul.mubr.bf16.gmra.mrb[128].mxu0 %v2534_v48  ;;  %v2491_v43 = vmax.f32 %v2287_v55, %v2427_v41 }
 0x437   : > { %v2426_v36 = vmul.f32 0.01, %v2282_v58  ;;  %v2489_v59 = vmax.f32 %v2279_v26, %v2425_v23 }
 0x438   : > { %v2492_v57 = vmax.f32 %v2290_v49, %v2428_v0 }
 0x439   : > { %v2490_v60 = vmax.f32 %v2282_v58, %v2426_v36  ;;  %v4244_v61 = vpop.f32.mrb[136].mxu1 }
 0x43a   : > { %v2303_v62 = vadd.f32 %v4244_v61, %v5091_v11  ;;  %v2294_v63 = vpop.f32.mrb[137].mxu1  ;;  %v2536_v2 = vpack.c.bf16 %v2492_v57, %v2491_v43 }
 0x43b   : > { %v2295_v3 = vadd.f32 %v5091_v11, %v2294_v63  ;;  %v4245_v4 = vpop.f32.mrb[138].mxu1  ;;  %v2535_v5 = vpack.c.bf16 %v2490_v60, %v2489_v59 }
 0x43c   : > { %v2431_v6 = vmul.f32 0.01, %v2303_v62  ;;  %v2306_v7 = vadd.f32 %v4245_v4, %v5091_v11  ;;  %v2297_v9 = vpop.f32.mrb[139].mxu1 }
 0x43d   : > { %v2429_v10 = vmul.f32 0.01, %v2295_v3  ;;  %v2298_v12 = vadd.f32 %v5091_v11, %v2297_v9  ;;  %4318 = vmatprep.mubr.bf16.mxu0 %v2535_v5 }
 0x43e   : > { %v2432_v35 = vmul.f32 0.01, %v2306_v7  ;;  %4319 = vmatmul.mubr.bf16.gmra.mrb[132].mxu0 %v2536_v2  ;;  %v2495_v14 = vmax.f32 %v2303_v62, %v2431_v6 }
 0x43f   : > { %v2430_v13 = vmul.f32 0.01, %v2298_v12  ;;  %v2493_v16 = vmax.f32 %v2295_v3, %v2429_v10 }
 0x440   : > { %v2496_v15 = vmax.f32 %v2306_v7, %v2432_v35 }
 0x441   : > { %v2494_v18 = vmax.f32 %v2298_v12, %v2430_v13  ;;  %v4248_v19 = vpop.f32.mrb[140].mxu1 }
 0x442   : > { %v2319_v20 = vadd.f32 %v4248_v19, %v5091_v11  ;;  %v2310_v21 = vpop.f32.mrb[141].mxu1  ;;  %v2538_v22 = vpack.c.bf16 %v2496_v15, %v2495_v14 }
 0x443   : > { %v2311_v24 = vadd.f32 %v5091_v11, %v2310_v21  ;;  %v4249_v25 = vpop.f32.mrb[142].mxu1  ;;  %v2537_v27 = vpack.c.bf16 %v2494_v18, %v2493_v16 }
 0x444   : > { %v2435_v28 = vmul.f32 0.01, %v2319_v20  ;;  %v2322_v29 = vadd.f32 %v4249_v25, %v5091_v11  ;;  %v2313_v30 = vpop.f32.mrb[143].mxu1 }
 0x445   : > { %v2433_v31 = vmul.f32 0.01, %v2311_v24  ;;  %v2314_v32 = vadd.f32 %v5091_v11, %v2313_v30  ;;  %4322 = vmatprep.mubr.bf16.mxu0 %v2537_v27 }
 0x446   : > { %v2436_v34 = vmul.f32 0.01, %v2322_v29  ;;  %4323 = vmatmul.mubr.bf16.gmra.mrb[136].mxu0 %v2538_v22  ;;  %v2499_v37 = vmax.f32 %v2319_v20, %v2435_v28 }
 0x447   : > { %v2434_v33 = vmul.f32 0.01, %v2314_v32  ;;  %v2497_v39 = vmax.f32 %v2311_v24, %v2433_v31 }
 0x448   : > { %v2500_v38 = vmax.f32 %v2322_v29, %v2436_v34 }
 0x449   : > { %v2498_v40 = vmax.f32 %v2314_v32, %v2434_v33  ;;  %v4252_v42 = vpop.f32.mrb[144].mxu1 }
 0x44a   : > { %v2335_v44 = vadd.f32 %v4252_v42, %v5091_v11  ;;  %v2326_v45 = vpop.f32.mrb[145].mxu1  ;;  %v2540_v46 = vpack.c.bf16 %v2500_v38, %v2499_v37 }
 0x44b   : > { %v2327_v47 = vadd.f32 %v5091_v11, %v2326_v45  ;;  %v4253_v50 = vpop.f32.mrb[146].mxu1  ;;  %v2539_v51 = vpack.c.bf16 %v2498_v40, %v2497_v39 }
 0x44c   : > { %v2439_v52 = vmul.f32 0.01, %v2335_v44  ;;  %v2338_v53 = vadd.f32 %v4253_v50, %v5091_v11  ;;  %v2329_v54 = vpop.f32.mrb[147].mxu1 }
 0x44d   : > { %v2437_v55 = vmul.f32 0.01, %v2327_v47  ;;  %v2330_v56 = vadd.f32 %v5091_v11, %v2329_v54  ;;  %4326 = vmatprep.mubr.bf16.mxu0 %v2539_v51 }
 0x44e   : > { %v2440_v48 = vmul.f32 0.01, %v2338_v53  ;;  %4327 = vmatmul.mubr.bf16.gmra.mrb[140].mxu0 %v2540_v46  ;;  %v2503_v1 = vmax.f32 %v2335_v44, %v2439_v52 }
 0x44f   : > { %v2438_v26 = vmul.f32 0.01, %v2330_v56  ;;  %v2501_v41 = vmax.f32 %v2327_v47, %v2437_v55 }
 0x450   : > { %v2504_v8 = vmax.f32 %v2338_v53, %v2440_v48  ;;  %v5160_v48 = vld [vmem:[%s5315_s2 + $0x4] ss:$0 sm:$0xff] }
 0x451   : > { %v2502_v49 = vmax.f32 %v2330_v56, %v2438_v26  ;;  %v4256_v17 = vpop.f32.mrb[148].mxu1 }
 0x452   : > { %v2351_v23 = vadd.f32 %v4256_v17, %v5091_v11  ;;  %v2342_v58 = vpop.f32.mrb[149].mxu1  ;;  %v2542_v0 = vpack.c.bf16 %v2504_v8, %v2503_v1 }
 0x453   : > { %v2343_v36 = vadd.f32 %v5091_v11, %v2342_v58  ;;  %v4257_v43 = vpop.f32.mrb[150].mxu1  ;;  %v2541_v57 = vpack.c.bf16 %v2502_v49, %v2501_v41 }
 0x454   : > { %v2443_v59 = vmul.f32 0.01, %v2351_v23  ;;  %v2354_v60 = vadd.f32 %v4257_v43, %v5091_v11  ;;  %v2345_v61 = vpop.f32.mrb[151].mxu1 }
 0x455   : > { %v2441_v62 = vmul.f32 0.01, %v2343_v36  ;;  %v2346_v63 = vadd.f32 %v5091_v11, %v2345_v61  ;;  %4330 = vmatprep.mubr.bf16.mxu0 %v2541_v57 }
 0x456   : > { %v2444_v2 = vmul.f32 0.01, %v2354_v60  ;;  %4331 = vmatmul.mubr.bf16.gmra.mrb[144].mxu0 %v2542_v0  ;;  %v2507_v4 = vmax.f32 %v2351_v23, %v2443_v59 }
 0x457   : > { %v2442_v3 = vmul.f32 0.01, %v2346_v63  ;;  %v2505_v6 = vmax.f32 %v2343_v36, %v2441_v62 }
 0x458   : > { %v2508_v5 = vmax.f32 %v2354_v60, %v2444_v2 }
 0x459   : > { %v2506_v7 = vmax.f32 %v2346_v63, %v2442_v3  ;;  %v4260_v9 = vpop.f32.mrb[152].mxu1 }
 0x45a   : > { %v2367_v10 = vadd.f32 %v4260_v9, %v5091_v11  ;;  %v2358_v12 = vpop.f32.mrb[153].mxu1  ;;  %v2544_v35 = vpack.c.bf16 %v2508_v5, %v2507_v4 }
 0x45b   : > { %v2359_v13 = vadd.f32 %v5091_v11, %v2358_v12  ;;  %v4261_v14 = vpop.f32.mrb[154].mxu1  ;;  %v2543_v15 = vpack.c.bf16 %v2506_v7, %v2505_v6 }
 0x45c   : > { %v2447_v16 = vmul.f32 0.01, %v2367_v10  ;;  %v2370_v18 = vadd.f32 %v4261_v14, %v5091_v11  ;;  %v2361_v19 = vpop.f32.mrb[155].mxu1 }
 0x45d   : > { %v2445_v20 = vmul.f32 0.01, %v2359_v13  ;;  %v2362_v21 = vadd.f32 %v5091_v11, %v2361_v19  ;;  %4334 = vmatprep.mubr.bf16.mxu0 %v2543_v15 }
 0x45e   : > { %v2448_v22 = vmul.f32 0.01, %v2370_v18  ;;  %4335 = vmatmul.mubr.bf16.gmra.mrb[148].mxu0 %v2544_v35  ;;  %v2511_v25 = vmax.f32 %v2367_v10, %v2447_v16 }
 0x45f   : > { %v2446_v24 = vmul.f32 0.01, %v2362_v21  ;;  %v2509_v28 = vmax.f32 %v2359_v13, %v2445_v20 }
 0x460   : > { %v2512_v27 = vmax.f32 %v2370_v18, %v2448_v22 }
 0x461   : > { %v2510_v29 = vmax.f32 %v2362_v21, %v2446_v24  ;;  %v4264_v30 = vpop.f32.mrb[156].mxu1 }
 0x462   : > { %v2383_v31 = vadd.f32 %v4264_v30, %v5091_v11  ;;  %v2374_v32 = vpop.f32.mrb[157].mxu1  ;;  %v2546_v34 = vpack.c.bf16 %v2512_v27, %v2511_v25 }
 0x463   : > { %v2375_v33 = vadd.f32 %v5091_v11, %v2374_v32  ;;  %v4265_v37 = vpop.f32.mrb[158].mxu1  ;;  %v2545_v38 = vpack.c.bf16 %v2510_v29, %v2509_v28 }
 0x464   : > { %v2451_v39 = vmul.f32 0.01, %v2383_v31  ;;  %v2386_v40 = vadd.f32 %v4265_v37, %v5091_v11  ;;  %v2377_v42 = vpop.f32.mrb[159].mxu1 }
 0x465   : > { %v2449_v44 = vmul.f32 0.01, %v2375_v33  ;;  %v2378_v45 = vadd.f32 %v5091_v11, %v2377_v42  ;;  %4338 = vmatprep.mubr.bf16.mxu0 %v2545_v38 }
 0x466   : > { %v2452_v46 = vmul.f32 0.01, %v2386_v40  ;;  %4339 = vmatmul.mubr.bf16.gmra.mrb[152].mxu0 %v2546_v34  ;;  %v2515_v50 = vmax.f32 %v2383_v31, %v2451_v39 }
 0x467   : > { %v2450_v47 = vmul.f32 0.01, %v2378_v45  ;;  %v2513_v52 = vmax.f32 %v2375_v33, %v2449_v44 }
 0x468   : > { %v2516_v51 = vmax.f32 %v2386_v40, %v2452_v46 }
 0x469   : > { %v2514_v53 = vmax.f32 %v2378_v45, %v2450_v47 }
 0x46a   : > { %v2548_v54 = vpack.c.bf16 %v2516_v51, %v2515_v50 }
 0x46b   : > { %v2547_v55 = vpack.c.bf16 %v2514_v53, %v2513_v52 }
 0x46d   : > { %4342 = vmatprep.mubr.bf16.mxu0 %v2547_v55 }
 0x46e   : > { %4343 = vmatmul.mubr.bf16.gmra.mrb[156].mxu0 %v2548_v54 }
 0x4c9   : > { %v4284_v56 = vpop.f32.mrb[96].mxu0 }
 0x4ca   : > { %v2656_v11 = vpop.f32.mrb[97].mxu0  ;;  %v2665_v1 = vadd.f32 %v4284_v56, %v5160_v48 }
 0x4cb   : > { %v4285_v26 = vpop.f32.mrb[98].mxu0  ;;  %v2657_v49 = vadd.f32 %v5160_v48, %v2656_v11 }
 0x4cc   : > { %v2668_v8 = vadd.f32 %v4285_v26, %v5160_v48  ;;  %v2659_v41 = vpop.f32.mrb[99].mxu0 }
 0x4cd   : > { %v2660_v17 = vadd.f32 %v5160_v48, %v2659_v41 }
 0x4ce   : > { %v3563_v23 = vpack.c.bf16 %v2668_v8, %v2665_v1 }
 0x4cf   : > { %v3558_v58 = vpack.c.bf16 %v2660_v17, %v2657_v49 }
 0x4d0   : > { %3715 = vst [vmem:[%s5168_s23 + $0x8] sm:$0xff] %v3563_v23  }
 0x4d1   : > { %3559 = vst [vmem:[%s5168_s23] sm:$0xff] %v3558_v58   ;;  %v4288_v0 = vpop.f32.mrb[100].mxu0 }
 0x4d2   : > { %v2672_v36 = vpop.f32.mrb[101].mxu0  ;;  %v2681_v57 = vadd.f32 %v4288_v0, %v5160_v48 }
 0x4d3   : > { %v4289_v43 = vpop.f32.mrb[102].mxu0  ;;  %v2673_v61 = vadd.f32 %v5160_v48, %v2672_v36 }
 0x4d4   : > { %v2684_v59 = vadd.f32 %v4289_v43, %v5160_v48  ;;  %v2675_v60 = vpop.f32.mrb[103].mxu0 }
 0x4d5   : > { %v2676_v62 = vadd.f32 %v5160_v48, %v2675_v60 }
 0x4d6   : > { %v3573_v63 = vpack.c.bf16 %v2684_v59, %v2681_v57 }
 0x4d7   : > { %v3568_v2 = vpack.c.bf16 %v2676_v62, %v2673_v61 }
 0x4d8   : > { %3717 = vst [vmem:[%s5168_s23 + $0x18] sm:$0xff] %v3573_v63  }
 0x4d9   : > { %3716 = vst [vmem:[%s5168_s23 + $0x10] sm:$0xff] %v3568_v2   ;;  %v4292_v3 = vpop.f32.mrb[104].mxu0 }
 0x4da   : > { %v2688_v4 = vpop.f32.mrb[105].mxu0  ;;  %v2697_v6 = vadd.f32 %v4292_v3, %v5160_v48 }
 0x4db   : > { %v4293_v5 = vpop.f32.mrb[106].mxu0  ;;  %v2689_v10 = vadd.f32 %v5160_v48, %v2688_v4 }
 0x4dc   : > { %v2700_v7 = vadd.f32 %v4293_v5, %v5160_v48  ;;  %v2691_v9 = vpop.f32.mrb[107].mxu0 }
 0x4dd   : > { %v2692_v12 = vadd.f32 %v5160_v48, %v2691_v9 }
 0x4de   : > { %v3583_v35 = vpack.c.bf16 %v2700_v7, %v2697_v6 }
 0x4df   : > { %v3578_v13 = vpack.c.bf16 %v2692_v12, %v2689_v10 }
 0x4e0   : > { %3719 = vst [vmem:[%s5168_s23 + $0x28] sm:$0xff] %v3583_v35  }
 0x4e1   : > { %3718 = vst [vmem:[%s5168_s23 + $0x20] sm:$0xff] %v3578_v13   ;;  %v4296_v14 = vpop.f32.mrb[108].mxu0 }
 0x4e2   : > { %v2704_v15 = vpop.f32.mrb[109].mxu0  ;;  %v2713_v18 = vadd.f32 %v4296_v14, %v5160_v48 }
 0x4e3   : > { %v4297_v16 = vpop.f32.mrb[110].mxu0  ;;  %v2705_v21 = vadd.f32 %v5160_v48, %v2704_v15 }
 0x4e4   : > { %v2716_v19 = vadd.f32 %v4297_v16, %v5160_v48  ;;  %v2707_v20 = vpop.f32.mrb[111].mxu0 }
 0x4e5   : > { %v2708_v22 = vadd.f32 %v5160_v48, %v2707_v20 }
 0x4e6   : > { %v3593_v24 = vpack.c.bf16 %v2716_v19, %v2713_v18 }
 0x4e7   : > { %v3588_v25 = vpack.c.bf16 %v2708_v22, %v2705_v21 }
 0x4e8   : > { %3721 = vst [vmem:[%s5168_s23 + $0x38] sm:$0xff] %v3593_v24  }
 0x4e9   : > { %3720 = vst [vmem:[%s5168_s23 + $0x30] sm:$0xff] %v3588_v25   ;;  %v4300_v27 = vpop.f32.mrb[112].mxu0 }
 0x4ea   : > { %v2720_v28 = vpop.f32.mrb[113].mxu0  ;;  %v2729_v30 = vadd.f32 %v4300_v27, %v5160_v48 }
 0x4eb   : > { %v4301_v29 = vpop.f32.mrb[114].mxu0  ;;  %v2721_v34 = vadd.f32 %v5160_v48, %v2720_v28 }
 0x4ec   : > { %v2732_v31 = vadd.f32 %v4301_v29, %v5160_v48  ;;  %v2723_v32 = vpop.f32.mrb[115].mxu0 }
 0x4ed   : > { %v2724_v33 = vadd.f32 %v5160_v48, %v2723_v32 }
 0x4ee   : > { %v3603_v37 = vpack.c.bf16 %v2732_v31, %v2729_v30 }
 0x4ef   : > { %v3598_v38 = vpack.c.bf16 %v2724_v33, %v2721_v34 }
 0x4f0   : > { %3723 = vst [vmem:[%s5168_s23 + $0x48] sm:$0xff] %v3603_v37  }
 0x4f1   : > { %3722 = vst [vmem:[%s5168_s23 + $0x40] sm:$0xff] %v3598_v38   ;;  %v4304_v39 = vpop.f32.mrb[116].mxu0 }
 0x4f2   : > { %v2736_v40 = vpop.f32.mrb[117].mxu0  ;;  %v2745_v44 = vadd.f32 %v4304_v39, %v5160_v48 }
 0x4f3   : > { %v4305_v42 = vpop.f32.mrb[118].mxu0  ;;  %v2737_v47 = vadd.f32 %v5160_v48, %v2736_v40 }
 0x4f4   : > { %v2748_v45 = vadd.f32 %v4305_v42, %v5160_v48  ;;  %v2739_v46 = vpop.f32.mrb[119].mxu0 }
 0x4f5   : > { %v2740_v50 = vadd.f32 %v5160_v48, %v2739_v46 }
 0x4f6   : > { %v3613_v51 = vpack.c.bf16 %v2748_v45, %v2745_v44 }
 0x4f7   : > { %v3608_v52 = vpack.c.bf16 %v2740_v50, %v2737_v47 }
 0x4f8   : > { %3725 = vst [vmem:[%s5168_s23 + $0x58] sm:$0xff] %v3613_v51  }
 0x4f9   : > { %3724 = vst [vmem:[%s5168_s23 + $0x50] sm:$0xff] %v3608_v52   ;;  %v4308_v53 = vpop.f32.mrb[120].mxu0 }
 0x4fa   : > { %v2752_v54 = vpop.f32.mrb[121].mxu0  ;;  %v2761_v56 = vadd.f32 %v4308_v53, %v5160_v48 }
 0x4fb   : > { %v4309_v55 = vpop.f32.mrb[122].mxu0  ;;  %v2753_v1 = vadd.f32 %v5160_v48, %v2752_v54 }
 0x4fc   : > { %v2764_v11 = vadd.f32 %v4309_v55, %v5160_v48  ;;  %v2755_v26 = vpop.f32.mrb[123].mxu0 }
 0x4fd   : > { %v2756_v8 = vadd.f32 %v5160_v48, %v2755_v26 }
 0x4fe   : > { %v3623_v41 = vpack.c.bf16 %v2764_v11, %v2761_v56 }
 0x4ff   : > { %v3618_v49 = vpack.c.bf16 %v2756_v8, %v2753_v1 }
 0x500   : > { %3727 = vst [vmem:[%s5168_s23 + $0x68] sm:$0xff] %v3623_v41  }
 0x501   : > { %3726 = vst [vmem:[%s5168_s23 + $0x60] sm:$0xff] %v3618_v49   ;;  %v4312_v17 = vpop.f32.mrb[124].mxu0 }
 0x502   : > { %v2768_v23 = vpop.f32.mrb[125].mxu0  ;;  %v2777_v0 = vadd.f32 %v4312_v17, %v5160_v48 }
 0x503   : > { %v4313_v58 = vpop.f32.mrb[126].mxu0  ;;  %v2769_v57 = vadd.f32 %v5160_v48, %v2768_v23 }
 0x504   : > { %v2780_v36 = vadd.f32 %v4313_v58, %v5160_v48  ;;  %v2771_v43 = vpop.f32.mrb[127].mxu0 }
 0x505   : > { %v2772_v59 = vadd.f32 %v5160_v48, %v2771_v43 }
 0x506   : > { %v3633_v60 = vpack.c.bf16 %v2780_v36, %v2777_v0 }
 0x507   : > { %v3628_v61 = vpack.c.bf16 %v2772_v59, %v2769_v57 }
 0x508   : > { %3729 = vst [vmem:[%s5168_s23 + $0x78] sm:$0xff] %v3633_v60  }
 0x509   : > { %3728 = vst [vmem:[%s5168_s23 + $0x70] sm:$0xff] %v3628_v61   ;;  %v4316_v62 = vpop.f32.mrb[128].mxu0 }
 0x50a   : > { %v2784_v63 = vpop.f32.mrb[129].mxu0  ;;  %v2793_v3 = vadd.f32 %v4316_v62, %v5160_v48 }
 0x50b   : > { %v4317_v2 = vpop.f32.mrb[130].mxu0  ;;  %v2785_v6 = vadd.f32 %v5160_v48, %v2784_v63 }
 0x50c   : > { %v2796_v4 = vadd.f32 %v4317_v2, %v5160_v48  ;;  %v2787_v5 = vpop.f32.mrb[131].mxu0 }
 0x50d   : > { %v2788_v7 = vadd.f32 %v5160_v48, %v2787_v5 }
 0x50e   : > { %v3643_v9 = vpack.c.bf16 %v2796_v4, %v2793_v3 }
 0x50f   : > { %v3638_v10 = vpack.c.bf16 %v2788_v7, %v2785_v6 }
 0x510   : > { %3731 = vst [vmem:[%s5168_s23 + $0x88] sm:$0xff] %v3643_v9  }
 0x511   : > { %3730 = vst [vmem:[%s5168_s23 + $0x80] sm:$0xff] %v3638_v10   ;;  %v4320_v12 = vpop.f32.mrb[132].mxu0 }
 0x512   : > { %v2800_v35 = vpop.f32.mrb[133].mxu0  ;;  %v2809_v14 = vadd.f32 %v4320_v12, %v5160_v48 }
 0x513   : > { %v4321_v13 = vpop.f32.mrb[134].mxu0  ;;  %v2801_v18 = vadd.f32 %v5160_v48, %v2800_v35 }
 0x514   : > { %v2812_v15 = vadd.f32 %v4321_v13, %v5160_v48  ;;  %v2803_v16 = vpop.f32.mrb[135].mxu0 }
 0x515   : > { %v2804_v19 = vadd.f32 %v5160_v48, %v2803_v16 }
 0x516   : > { %v3653_v20 = vpack.c.bf16 %v2812_v15, %v2809_v14 }
 0x517   : > { %v3648_v21 = vpack.c.bf16 %v2804_v19, %v2801_v18 }
 0x518   : > { %3733 = vst [vmem:[%s5168_s23 + $0x98] sm:$0xff] %v3653_v20  }
 0x519   : > { %3732 = vst [vmem:[%s5168_s23 + $0x90] sm:$0xff] %v3648_v21   ;;  %v4324_v22 = vpop.f32.mrb[136].mxu0 }
 0x51a   : > { %v2816_v24 = vpop.f32.mrb[137].mxu0  ;;  %v2825_v27 = vadd.f32 %v4324_v22, %v5160_v48 }
 0x51b   : > { %v4325_v25 = vpop.f32.mrb[138].mxu0  ;;  %v2817_v30 = vadd.f32 %v5160_v48, %v2816_v24 }
 0x51c   : > { %v2828_v28 = vadd.f32 %v4325_v25, %v5160_v48  ;;  %v2819_v29 = vpop.f32.mrb[139].mxu0 }
 0x51d   : > { %v2820_v31 = vadd.f32 %v5160_v48, %v2819_v29 }
 0x51e   : > { %v3663_v32 = vpack.c.bf16 %v2828_v28, %v2825_v27 }
 0x51f   : > { %v3658_v34 = vpack.c.bf16 %v2820_v31, %v2817_v30 }
 0x520   : > { %3735 = vst [vmem:[%s5168_s23 + $0xa8] sm:$0xff] %v3663_v32  }
 0x521   : > { %3734 = vst [vmem:[%s5168_s23 + $0xa0] sm:$0xff] %v3658_v34   ;;  %v4328_v33 = vpop.f32.mrb[140].mxu0 }
 0x522   : > { %v2832_v37 = vpop.f32.mrb[141].mxu0  ;;  %v2841_v39 = vadd.f32 %v4328_v33, %v5160_v48 }
 0x523   : > { %v4329_v38 = vpop.f32.mrb[142].mxu0  ;;  %v2833_v44 = vadd.f32 %v5160_v48, %v2832_v37 }
 0x524   : > { %v2844_v40 = vadd.f32 %v4329_v38, %v5160_v48  ;;  %v2835_v42 = vpop.f32.mrb[143].mxu0 }
 0x525   : > { %v2836_v45 = vadd.f32 %v5160_v48, %v2835_v42 }
 0x526   : > { %v3673_v46 = vpack.c.bf16 %v2844_v40, %v2841_v39 }
 0x527   : > { %v3668_v47 = vpack.c.bf16 %v2836_v45, %v2833_v44 }
 0x528   : > { %3737 = vst [vmem:[%s5168_s23 + $0xb8] sm:$0xff] %v3673_v46  }
 0x529   : > { %3736 = vst [vmem:[%s5168_s23 + $0xb0] sm:$0xff] %v3668_v47   ;;  %v4332_v50 = vpop.f32.mrb[144].mxu0 }
 0x52a   : > { %v2848_v51 = vpop.f32.mrb[145].mxu0  ;;  %v2857_v53 = vadd.f32 %v4332_v50, %v5160_v48 }
 0x52b   : > { %v4333_v52 = vpop.f32.mrb[146].mxu0  ;;  %v2849_v56 = vadd.f32 %v5160_v48, %v2848_v51 }
 0x52c   : > { %v2860_v54 = vadd.f32 %v4333_v52, %v5160_v48  ;;  %v2851_v55 = vpop.f32.mrb[147].mxu0 }
 0x52d   : > { %v2852_v11 = vadd.f32 %v5160_v48, %v2851_v55 }
 0x52e   : > { %v3683_v26 = vpack.c.bf16 %v2860_v54, %v2857_v53 }
 0x52f   : > { %v3678_v1 = vpack.c.bf16 %v2852_v11, %v2849_v56 }
 0x530   : > { %3739 = vst [vmem:[%s5168_s23 + $0xc8] sm:$0xff] %v3683_v26  }
 0x531   : > { %3738 = vst [vmem:[%s5168_s23 + $0xc0] sm:$0xff] %v3678_v1   ;;  %v4336_v8 = vpop.f32.mrb[148].mxu0 }
 0x532   : > { %v2864_v41 = vpop.f32.mrb[149].mxu0  ;;  %v2873_v17 = vadd.f32 %v4336_v8, %v5160_v48 }
 0x533   : > { %v4337_v49 = vpop.f32.mrb[150].mxu0  ;;  %v2865_v0 = vadd.f32 %v5160_v48, %v2864_v41 }
 0x534   : > { %v2876_v23 = vadd.f32 %v4337_v49, %v5160_v48  ;;  %v2867_v58 = vpop.f32.mrb[151].mxu0 }
 0x535   : > { %v2868_v36 = vadd.f32 %v5160_v48, %v2867_v58 }
 0x536   : > { %v3693_v43 = vpack.c.bf16 %v2876_v23, %v2873_v17 }
 0x537   : > { %v3688_v57 = vpack.c.bf16 %v2868_v36, %v2865_v0 }
 0x538   : > { %3741 = vst [vmem:[%s5168_s23 + $0xd8] sm:$0xff] %v3693_v43  }
 0x539   : > { %3740 = vst [vmem:[%s5168_s23 + $0xd0] sm:$0xff] %v3688_v57   ;;  %v4340_v59 = vpop.f32.mrb[152].mxu0 }
 0x53a   : > { %v2880_v60 = vpop.f32.mrb[153].mxu0  ;;  %v2889_v62 = vadd.f32 %v4340_v59, %v5160_v48 }
 0x53b   : > { %v4341_v61 = vpop.f32.mrb[154].mxu0  ;;  %v2881_v3 = vadd.f32 %v5160_v48, %v2880_v60 }
 0x53c   : > { %v2892_v63 = vadd.f32 %v4341_v61, %v5160_v48  ;;  %v2883_v2 = vpop.f32.mrb[155].mxu0 }
 0x53d   : > { %v2884_v4 = vadd.f32 %v5160_v48, %v2883_v2 }
 0x53e   : > { %v3703_v5 = vpack.c.bf16 %v2892_v63, %v2889_v62 }
 0x53f   : > { %v3698_v6 = vpack.c.bf16 %v2884_v4, %v2881_v3 }
 0x540   : > { %3743 = vst [vmem:[%s5168_s23 + $0xe8] sm:$0xff] %v3703_v5  }
 0x541   : > { %3742 = vst [vmem:[%s5168_s23 + $0xe0] sm:$0xff] %v3698_v6   ;;  %v4344_v7 = vpop.f32.mrb[156].mxu0 }
 0x542   : > { %v2896_v9 = vpop.f32.mrb[157].mxu0  ;;  %v2905_v12 = vadd.f32 %v4344_v7, %v5160_v48 }
 0x543   : > { %v4345_v10 = vpop.f32.mrb[158].mxu0  ;;  %v2897_v14 = vadd.f32 %v5160_v48, %v2896_v9 }
 0x544   : > { %v2908_v35 = vadd.f32 %v4345_v10, %v5160_v48  ;;  %v2899_v13 = vpop.f32.mrb[159].mxu0 }
 0x545   : > { %v2900_v15 = vadd.f32 %v5160_v48, %v2899_v13 }
 0x546   : > { %v3713_v16 = vpack.c.bf16 %v2908_v35, %v2905_v12 }
 0x547   : > { %v3708_v18 = vpack.c.bf16 %v2900_v15, %v2897_v14 }
 0x548   : > { %3745 = vst [vmem:[%s5168_s23 + $0xf8] sm:$0xff] %v3713_v16  }
 0x549   : > { %3744 = vst [vmem:[%s5168_s23 + $0xf0] sm:$0xff] %v3708_v18  }
 0x54a   : > { %4566 = shalt.err (!%p4563_p7)
}
 0x54b   : > { %s4567_s9 = scalar_lea.hbm %s5265_s10, 4096  ;;  %s4571_s5 = scalar_lea.hbm %s5316_s3, 8192 }
 0x54c   : > { %p4568_p9 = scmp.ne.s32.totalorder %s5265_s10, %s4567_s9  ;;  %p4572_p5 = scmp.lt.u32.totalorder %s5265_s10, %s5316_s3 }
 0x54d   : > { %p4573_p11 = scmp.lt.u32.totalorder %s4571_s5, %s4567_s9  ;;  %p4575_p4 = scmp.lt.u32.totalorder %s4567_s9, %s5265_s10 }
 0x54e   : > { %p4569_p1 = pnand %p4568_p9, %p4746_p12 }
 0x54f   : > { %p4574_p2 = por %p4573_p11, %p4572_p5 }
 0x550   : > { %p4570_p0 = pneg %p4569_p1 }
 0x551   : > { %p4576_p6 = por %p4575_p4, %p4574_p2 }
 0x553   : > { %p4577_p8 = pnand %p4576_p6, %p4570_p0 }
 0x555   : > { %4580 = shalt.err (!%p4577_p8)
}
 0x556   : > { %s4630_s28 = smov 64   ;;  %s4631_s23 = smov 4  }
 0x557   : > { %4368 = dma.vmem_to_hbm [thread:$0]  (%p4746_p12), %s5267_s30, 4096, %s5265_s10, %s3232_s16, %s4630_s28, %s4630_s28, %s4631_s23  }
 0x558 PF: > { %s3260_s29 = sand.u32 1, %s4611_s12   ;;  %p5331_p10 = scmp.ne.s32.totalorder %s5321_s19, 0 }
 0x559   : > { %p5332_p13 = scmp.ge.s32.totalorder %s4623_s15, 2  ;;  %s3261_s22 = scalar_lea.sflag [#allocation4], %s3260_s29 }
 0x55b   : > { %p4379_p3 = pnand %p5332_p13, %p5331_p10 }
 0x55d   : > { %4606 = dma.done.wait (!%p4379_p3), %s3261_s22, 4096  }
 0x55e   : > { %4608 = vsyncadd (!%p4379_p3), %s3261_s22, 4294963200  ;;  %p17_p7 = scmp.ge.s32.totalorder %s4708_s24, 4   ;;  %s5333_s12 = smov %s4615_s13 }
 0x55f   : > { %s5334_s13 = smov %s4619_s14  ;;  %s5335_s14 = smov %s4742_s17 }
 0x560   : > { %s5336_s15 = smov %s4708_s24  ;;  %19 = sbr.rel (!%p17_p7) target bundleno = 6 (0x6), region = 89 }
 0x567   :  { %3266 = vsyncpa [#allocation3], 1 }
 0x568   :  { %3268 = vsyncpa [#allocation3 + $0x1], 1 }
 0x569   :  { %3269 = vsyncpa [#allocation6], 1 }
 0x56a   :  { %3270 = vsyncpa [#allocation4], 1 }
 0x56b   :  { %3272 = vsyncpa [#allocation4 + $0x1], 1 }

</bundles_post_ra>
